<compile_context>
chip_gen: v6e
topology: v6e:2x2x1
jax: 0.10.0
libtpu: 0.0.40
codegen_flags: <defaults>
</compile_context>

<pallas_src>
import math

import jax
import jax.numpy as jnp
from jax import lax
from jax.experimental import pallas as pl
from jax.experimental.pallas import tpu as pltpu

# ----------------------------- config ---------------------------------------
NA = 5            # n_agents
NE = 6            # n_enemies
AF = 11           # state_ally_feats_size
EF = 7            # state_enemy_feats_size
H = 32            # hypernet_embed
E = 32            # mixing_embed_dim
AH = 64           # api_hyper_dim
B, T = 2, 8
STATE_DIM = NA * AF + NE * EF          # 97


# ----------------------------- kernel ---------------------------------------
def api_qmix_kernel(
    q_ref,        # [TB*NA, 1]        per-agent q values (f32)
    state_ref,    # [TB, 98]          flat state | ones column (bf16)
    ally_ref,     # [TB*NA, 12]       per-agent ally feats | ones column (bf16)
    w_state_ref,  # [98, 128]         fused input-layer weights, bias row last (bf16)
    w_l2b_ref,    # [65, 33]          block-diag [w2 Linear | b2 Linear], bias row last (f32)
    h1_w_ref,     # [12, 65]          hyper_w1 MLP layer1 (bias row + ones-out col) (bf16)
    w_h2_ref,     # [65, 1056]        hyper_w1 MLP layer2 (w|b cols, bias row last) (bf16)
    out_ref,      # [TB, 1]           mixed Q_tot (f32)
):
    f32 = jnp.float32
    bf16 = jnp.bfloat16
    tb = state_ref.shape[0]
    tbn = q_ref.shape[0]          # tb * NA

    def dot(a, b):
        return jnp.dot(a, b, preferred_element_type=f32)

    def relu(x):
        return jnp.maximum(x, 0.0)

    def selector(shape, blocked_axis, block):
        # 0/1 matrix with entry 1 iff idx[blocked_axis] // block == idx[other].
        # Built with iota + range compares (no vector int div/mod), f32, exact
        # in bf16, so feeding it to the MXU is lossless.
        b_idx = lax.broadcasted_iota(jnp.int32, shape, blocked_axis)
        o_idx = lax.broadcasted_iota(jnp.int32, shape, 1 - blocked_axis)
        lo = o_idx * block
        return jnp.where((b_idx >= lo) & (b_idx < lo + block),
                         jnp.float32(1.0), jnp.float32(0.0))

    # ---- all four API_InputLayers in a single matmul (bias folded in weight) ----
    z = dot(state_ref[...], w_state_ref[...])            # [tb, 128] f32
    hidden = relu(z[:, 0:H])                             # hyper_w1 input layer + ReLU
    b1 = z[:, H:H + E]                                   # hyper_b1 (no activation)
    l2_in = relu(z[:, H + E:])                           # relu(w2 in) | relu(b2 in)

    # ---- hyper_w2 / hyper_b2 output Linears (block-diag, bias row at bottom) ----
    l2 = dot(l2_in, w_l2b_ref[0:H + E, :]) + w_l2b_ref[H + E:H + E + 1, :]   # [tb, 33]
    w2 = jnp.abs(l2[:, 0:E])                             # pos_func on w2
    b2 = l2[:, E:E + 1]                                  # [tb, 1]

    # ---- HyperW1 output MLP (per agent); both biases folded into the weights ----
    h_ally = relu(dot(ally_ref[...], h1_w_ref[...]))     # [tbn, AH+1], last col == 1
    wb = dot(h_ally.astype(bf16), w_h2_ref[...])         # [tbn, H*E + E]

    # ---- w1[r, e] = sum_h hidden[r//NA, h] * wb[r, h*E+e] + wb[r, H*E+e] ----
    repb = selector((tbn, tb), 0, NA)                    # [tbn, tb] replication
    expand = selector((H, H * E), 1, E)                  # [H, H*E]  lane expansion
    hidden_exp = dot(dot(repb, hidden), expand)          # [tbn, H*E] (idle MXU)
    prod = hidden_exp * wb[:, 0:H * E]                   # f32 VPU, fully lane aligned

    # lane-aligned tree reduction of the 32-wide h-blocks:
    # 8 aligned 128-lane blocks -> tree add -> fold 128 -> 64 -> 32 lanes.
    blocks = [prod[:, k * 128:(k + 1) * 128] for k in range(H * E // 128)]
    while len(blocks) > 1:
        blocks = [blocks[i] + blocks[i + 1] for i in range(0, len(blocks), 2)]
    x = blocks[0]                                        # [tbn, 128]
    y = x[:, 0:64] + x[:, 64:128]                        # [tbn, 64]
    w1 = jnp.abs(y[:, 0:E] + y[:, E:2 * E] + wb[:, H * E:])   # [tbn, E] pos_func

    # ---- mixing (f32 elementwise path) ----
    agg = selector((tb, tbn), 1, NA)                     # [tb, tbn] per-state sum
    mixed = dot(agg, q_ref[...] * w1) + b1               # [tb, E]
    hidden2 = jnp.where(mixed > 0, mixed,
                        jnp.exp(jnp.minimum(mixed, 0.0)) - 1.0)   # ELU
    out_ref[...] = jnp.sum(hidden2 * w2, axis=-1, keepdims=True) + b2


# ----------------------------- packing ---------------------------------------
def _pack_params(p):
    f32 = jnp.float32
    bf16 = jnp.bfloat16

    # fused input-layer weight: ally/enemy embeddings tiled along the state rows,
    # the shared bias appended as the last weight row (state gets a ones column).
    wa = jnp.concatenate([p["wa_w1"], p["wa_b1"], p["wa_w2"], p["wa_b2"]], axis=1)   # [AF, 128]
    we = jnp.concatenate([p["we_w1"], p["we_b1"], p["we_w2"], p["we_b2"]], axis=1)   # [EF, 128]
    bias = jnp.concatenate([p["bi_w1"], p["bi_b1"], p["bi_w2"], p["bi_b2"]], axis=1) # [1, 128]
    w_state_aug = jnp.concatenate(
        [jnp.tile(wa, (NA, 1)), jnp.tile(we, (NE, 1)), bias], axis=0).astype(bf16)   # [98, 128]

    # block-diagonal fusion of the hyper_w2 / hyper_b2 output Linears + bias row
    w_l2 = jnp.zeros((H + E, E + 1), f32)
    w_l2 = w_l2.at[:H, :E].set(p["w2l_w"]).at[H:, E:].set(p["b2l_w"])
    b_l2 = jnp.concatenate([p["w2l_b"], p["b2l_b"]], axis=1)
    w_l2b = jnp.concatenate([w_l2, b_l2], axis=0).astype(f32)                        # [65, 33]

    # hyper_w1 output MLP layer 1: bias folded as last row; extra output column
    # that evaluates to exactly 1.0 (survives the ReLU) to carry layer-2's bias.
    h1_w_aug = jnp.zeros((AF + 1, AH + 1), f32)
    h1_w_aug = h1_w_aug.at[:AF, :AH].set(p["h1_w"])
    h1_w_aug = h1_w_aug.at[AF, :AH].set(p["h1_b"][0])
    h1_w_aug = h1_w_aug.at[AF, AH].set(1.0)
    h1_w_aug = h1_w_aug.astype(bf16)                                                 # [12, 65]

    # hyper_w1 output MLP layer 2: w-cols | b-cols, bias folded as last row.
    w_h2 = jnp.concatenate([p["h2w_w"], p["h2b_w"]], axis=1)                         # [AH, 1056]
    b_h2 = jnp.concatenate([p["h2w_b"], p["h2b_b"]], axis=1)                         # [1, 1056]
    w_h2_aug = jnp.concatenate([w_h2, b_h2], axis=0).astype(bf16)                    # [65, 1056]

    return w_state_aug, w_l2b, h1_w_aug, w_h2_aug


def _choose_tb(bt, tb_max):
    """Largest tile of states per grid step: whole batch if it fits, else the
    largest multiple-of-16 divisor of bt (keeps bf16 sublane tiling happy)."""
    if bt <= tb_max:
        return bt
    for tb in range(tb_max - tb_max % 16, 0, -16):
        if bt % tb == 0:
            return tb
    return bt   # fall back to a single step


# ----------------------------- wrapper ---------------------------------------
def api_qmixer_forward(qvals, states, params, *, tb_max=128):
    f32 = jnp.float32
    bf16 = jnp.bfloat16
    b, t, _ = qvals.shape
    bt = b * t
    TB = _choose_tb(bt, tb_max)
    assert bt % TB == 0

    states2 = states.reshape(bt, STATE_DIM).astype(f32)
    state_aug = jnp.concatenate(
        [states2, jnp.ones((bt, 1), f32)], axis=1).astype(bf16)          # [bt, 98]
    ally = states2[:, :NA * AF].reshape(bt * NA, AF)
    ally_aug = jnp.concatenate(
        [ally, jnp.ones((bt * NA, 1), f32)], axis=1).astype(bf16)        # [bt*NA, 12]
    q_col = qvals.reshape(bt * NA, 1).astype(f32)

    w_state_aug, w_l2b, h1_w_aug, w_h2_aug = _pack_params(params)

    def const_spec(a):
        return pl.BlockSpec(a.shape, lambda i: (0, 0))

    in_specs = [
        pl.BlockSpec((TB * NA, 1), lambda i: (i, 0)),          # q values
        pl.BlockSpec((TB, STATE_DIM + 1), lambda i: (i, 0)),   # state | 1
        pl.BlockSpec((TB * NA, AF + 1), lambda i: (i, 0)),     # ally feats | 1
        const_spec(w_state_aug),
        const_spec(w_l2b),
        const_spec(h1_w_aug),
        const_spec(w_h2_aug),
    ]

    out = pl.pallas_call(
        api_qmix_kernel,
        out_shape=jax.ShapeDtypeStruct((bt, 1), f32),
        grid_spec=pltpu.PrefetchScalarGridSpec(
            num_scalar_prefetch=0,
            grid=(bt // TB,),
            in_specs=in_specs,
            out_specs=pl.BlockSpec((TB, 1), lambda i: (i, 0)),
        ),
        compiler_params=pltpu.CompilerParams(
            # latency-bound kernel: keep it single-core (no megacore split)
            dimension_semantics=("arbitrary",),
            # safe on v5e/v6e/v7x; only matters if tb_max is raised a lot
            vmem_limit_bytes=32 * 1024 * 1024,
        ),
    )(q_col, state_aug, ally_aug, w_state_aug, w_l2b, h1_w_aug, w_h2_aug)
    return out.reshape(b, t, 1)


# ----------------------------- params ----------------------------------------
def make_params(key):
    gain = 12 ** (-0.5)

    def kaiming_uniform(k, fan_in, shape):
        bound = math.sqrt(3.0) * gain / math.sqrt(fan_in)
        return jax.random.uniform(k, shape, jnp.float32, -bound, bound)

    def bias_uniform(k, fan_in, shape):
        bound = 1.0 / math.sqrt(fan_in)
        return jax.random.uniform(k, shape, jnp.float32, -bound, bound)

    keys = iter(jax.random.split(key, 32))
    p = {}
    fan_state_bias = NE * EF + NA * AF
    # four API_InputLayer instances (hyper_w1 in, hyper_b1, hyper_w2 in, hyper_b2 in)
    for name, out in (("w1", H), ("b1", E), ("w2", H), ("b2", E)):
        p[f"wa_{name}"] = kaiming_uniform(next(keys), AF, (AF, out))
        p[f"we_{name}"] = kaiming_uniform(next(keys), EF, (EF, out))
        p[f"bi_{name}"] = bias_uniform(next(keys), fan_state_bias, (1, out))
    # hyper_w2 / hyper_b2 final Linears
    p["w2l_w"] = kaiming_uniform(next(keys), H, (H, E))
    p["w2l_b"] = bias_uniform(next(keys), H, (1, E))
    p["b2l_w"] = kaiming_uniform(next(keys), E, (E, 1))
    p["b2l_b"] = bias_uniform(next(keys), E, (1, 1))
    # HyperW1 output MLP; Linear(AH, (H+1)*E) split column-wise into the H*E
    # "w" columns and the E "b" columns (same layout as the torch .view slicing)
    p["h1_w"] = kaiming_uniform(next(keys), AF, (AF, AH))
    p["h1_b"] = bias_uniform(next(keys), AF, (1, AH))
    p["h2w_w"] = kaiming_uniform(next(keys), AH, (AH, H * E))
    p["h2w_b"] = bias_uniform(next(keys), AH, (1, H * E))
    p["h2b_w"] = kaiming_uniform(next(keys), AH, (AH, E))
    p["h2b_b"] = bias_uniform(next(keys), AH, (1, E))
    return p


# ----------------------------- pure-JAX reference -----------------------------
def reference_forward(qvals, states, p):
    b, t, _ = qvals.shape
    bt = b * t
    q3 = qvals.reshape(bt, 1, NA)
    states2 = states.reshape(bt, STATE_DIM)
    ally = states2[:, :NA * AF].reshape(bt * NA, AF)
    enemy = states2[:, NA * AF:].reshape(bt * NE, EF)
    relu = jax.nn.relu

    def input_layer(name):
        a = (ally @ p[f"wa_{name}"]).reshape(bt, NA, -1).sum(axis=1)
        e = (enemy @ p[f"we_{name}"]).reshape(bt, NE, -1).sum(axis=1)
        return a + e + p[f"bi_{name}"]

    hidden = relu(input_layer("w1"))                                      # [bt, H]
    h_ally = relu(ally @ p["h1_w"] + p["h1_b"])                           # [bt*NA, AH]
    hyper_out = jnp.concatenate(
        [(h_ally @ p["h2w_w"] + p["h2w_b"]).reshape(bt * NA, H, E),
         (h_ally @ p["h2b_w"] + p["h2b_b"]).reshape(bt * NA, 1, E)],
        axis=1).reshape(bt, NA, H + 1, E)
    w_ally = hyper_out[:, :, :-1]
    b_ally = hyper_out[:, :, -1:]
    w_ally = jnp.transpose(w_ally, (0, 2, 1, 3)).reshape(bt, H, NA * E)
    b_ally = b_ally.reshape(bt, 1, NA * E)
    main_w1 = jnp.matmul(hidden[:, None, :], w_ally) + b_ally             # [bt, 1, NA*E]
    w1 = jnp.abs(main_w1.reshape(bt, NA, E))

    b1 = input_layer("b1")[:, None, :]
    w2 = jnp.abs(relu(input_layer("w2")) @ p["w2l_w"] + p["w2l_b"])[:, :, None]
    b2 = (relu(input_layer("b2")) @ p["b2l_w"] + p["b2l_b"])[:, :, None]

    hid = jnp.matmul(q3, w1) + b1
    hid = jnp.where(hid > 0, hid, jnp.exp(jnp.minimum(hid, 0.0)) - 1.0)   # ELU
    y = jnp.matmul(hid, w2) + b2
    return y.reshape(b, t, 1)


# TODO(synk): the optional state_last_action / state_timestep_number branches of
# API_InputLayer are disabled in this config (as in the reference) and are not
# implemented.

if __name__ == "__main__":
    key = jax.random.PRNGKey(0)
    k_q, k_s, k_p = jax.random.split(key, 3)
    qvals = jax.random.normal(k_q, (B, T, NA), jnp.float32)
    states = jax.random.normal(k_s, (B, T, STATE_DIM), jnp.float32)
    params = make_params(k_p)

    y = jax.block_until_ready(api_qmixer_forward(qvals, states, params))
    assert y.shape == (B, T, 1)

    # reference at full f32 ('highest') precision; the kernel uses default
    # single-pass bf16 MXU precision + bf16 weight slabs, so compare with a
    # 5%-of-output-scale error bound.
    with jax.default_matmul_precision("highest"):
        y_ref = jax.block_until_ready(reference_forward(qvals, states, params))

    import numpy as np
    y_np = np.asarray(y)
    y_ref_np = np.asarray(y_ref)
    scale = max(float(np.max(np.abs(y_ref_np))), 1.0)
    max_err = float(np.max(np.abs(y_np - y_ref_np)))
    assert max_err <= 5e-2 * scale, f"max_err={max_err} scale={scale}"
    print("KERNEL_OK")
</pallas_src>

<mosaic_0001>
module attributes {stable_mosaic.version = 11 : i64} {
  func.func @api_qmix_kernel(%arg0: i32, %arg1: memref<80x1xf32, #tpu.memory_space<vmem>>, %arg2: memref<16x98xbf16, #tpu.memory_space<vmem>>, %arg3: memref<80x12xbf16, #tpu.memory_space<vmem>>, %arg4: memref<98x128xbf16, #tpu.memory_space<vmem>>, %arg5: memref<65x33xf32, #tpu.memory_space<vmem>>, %arg6: memref<12x65xbf16, #tpu.memory_space<vmem>>, %arg7: memref<65x1056xbf16, #tpu.memory_space<vmem>>, %arg8: memref<16x1xf32, #tpu.memory_space<vmem>>) attributes {dimension_semantics = [#tpu.dimension_semantics<arbitrary>], iteration_bounds = array<i64: 1>, scalar_prefetch = 0 : i64, scratch_operands = 0 : i64, tpu.core_type = #tpu.core_type<tc>, window_params = [{transform_indices = @transform_0, window_bounds = array<i64: 80, 1>}, {transform_indices = @transform_1, window_bounds = array<i64: 16, 98>}, {transform_indices = @transform_2, window_bounds = array<i64: 80, 12>}, {pipeline_mode = #tpu.pipeline_mode<synchronous>, transform_indices = @transform_3, window_bounds = array<i64: 98, 128>}, {pipeline_mode = #tpu.pipeline_mode<synchronous>, transform_indices = @transform_4, window_bounds = array<i64: 65, 33>}, {pipeline_mode = #tpu.pipeline_mode<synchronous>, transform_indices = @transform_5, window_bounds = array<i64: 12, 65>}, {pipeline_mode = #tpu.pipeline_mode<synchronous>, transform_indices = @transform_6, window_bounds = array<i64: 65, 1056>}, {transform_indices = @transform_7, window_bounds = array<i64: 16, 1>}]} {
    %c0 = arith.constant 0 : index
    %c0_0 = arith.constant 0 : index
    %0 = vector.load %arg2[%c0, %c0_0] : memref<16x98xbf16, #tpu.memory_space<vmem>>, vector<16x98xbf16>
    %c0_1 = arith.constant 0 : index
    %c0_2 = arith.constant 0 : index
    %1 = vector.load %arg4[%c0_1, %c0_2] : memref<98x128xbf16, #tpu.memory_space<vmem>>, vector<98x128xbf16>
    %cst = arith.constant dense<0.000000e+00> : vector<16x128xf32>
    %2 = tpu.matmul %0, %1, %cst {dimension_numbers = #tpu.dot_dimension_numbers<[1], [0], [0], [1], [0, 0, 1, 1], [], []>} : vector<16x98xbf16>, vector<98x128xbf16>, vector<16x128xf32> -> vector<16x128xf32>
    %3 = vector.extract_strided_slice %2 {offsets = [0, 0], sizes = [16, 32], strides = [1, 1]} : vector<16x128xf32> to vector<16x32xf32>
    %cst_3 = arith.constant 0.000000e+00 : f32
    %4 = vector.broadcast %cst_3 : f32 to vector<16x32xf32>
    %5 = arith.maximumf %3, %4 : vector<16x32xf32>
    %6 = vector.extract_strided_slice %2 {offsets = [0, 32], sizes = [16, 32], strides = [1, 1]} : vector<16x128xf32> to vector<16x32xf32>
    %7 = vector.extract_strided_slice %2 {offsets = [0, 64], sizes = [16, 64], strides = [1, 1]} : vector<16x128xf32> to vector<16x64xf32>
    %cst_4 = arith.constant 0.000000e+00 : f32
    %8 = vector.broadcast %cst_4 : f32 to vector<16x64xf32>
    %9 = arith.maximumf %7, %8 : vector<16x64xf32>
    %c0_5 = arith.constant 0 : index
    %c0_6 = arith.constant 0 : index
    %10 = vector.load %arg5[%c0_5, %c0_6] : memref<65x33xf32, #tpu.memory_space<vmem>>, vector<64x33xf32>
    %cst_7 = arith.constant dense<0.000000e+00> : vector<16x33xf32>
    %11 = tpu.matmul %9, %10, %cst_7 {dimension_numbers = #tpu.dot_dimension_numbers<[1], [0], [0], [1], [0, 0, 1, 1], [], []>} : vector<16x64xf32>, vector<64x33xf32>, vector<16x33xf32> -> vector<16x33xf32>
    %c64 = arith.constant 64 : index
    %c0_8 = arith.constant 0 : index
    %12 = vector.load %arg5[%c64, %c0_8] : memref<65x33xf32, #tpu.memory_space<vmem>>, vector<1x33xf32>
    %13 = vector.broadcast %12 : vector<1x33xf32> to vector<16x33xf32>
    %14 = arith.addf %11, %13 : vector<16x33xf32>
    %15 = vector.extract_strided_slice %14 {offsets = [0, 0], sizes = [16, 32], strides = [1, 1]} : vector<16x33xf32> to vector<16x32xf32>
    %16 = math.absf %15 : vector<16x32xf32>
    %17 = vector.extract_strided_slice %14 {offsets = [0, 32], sizes = [16, 1], strides = [1, 1]} : vector<16x33xf32> to vector<16x1xf32>
    %c0_9 = arith.constant 0 : index
    %c0_10 = arith.constant 0 : index
    %18 = vector.load %arg3[%c0_9, %c0_10] : memref<80x12xbf16, #tpu.memory_space<vmem>>, vector<80x12xbf16>
    %c0_11 = arith.constant 0 : index
    %c0_12 = arith.constant 0 : index
    %19 = vector.load %arg6[%c0_11, %c0_12] : memref<12x65xbf16, #tpu.memory_space<vmem>>, vector<12x65xbf16>
    %cst_13 = arith.constant dense<0.000000e+00> : vector<80x65xf32>
    %20 = tpu.matmul %18, %19, %cst_13 {dimension_numbers = #tpu.dot_dimension_numbers<[1], [0], [0], [1], [0, 0, 1, 1], [], []>} : vector<80x12xbf16>, vector<12x65xbf16>, vector<80x65xf32> -> vector<80x65xf32>
    %cst_14 = arith.constant 0.000000e+00 : f32
    %21 = vector.broadcast %cst_14 : f32 to vector<80x65xf32>
    %22 = arith.maximumf %20, %21 : vector<80x65xf32>
    %23 = arith.truncf %22 : vector<80x65xf32> to vector<80x65xbf16>
    %c0_15 = arith.constant 0 : index
    %c0_16 = arith.constant 0 : index
    %24 = vector.load %arg7[%c0_15, %c0_16] : memref<65x1056xbf16, #tpu.memory_space<vmem>>, vector<65x1056xbf16>
    %cst_17 = arith.constant dense<0.000000e+00> : vector<80x1056xf32>
    %25 = tpu.matmul %23, %24, %cst_17 {dimension_numbers = #tpu.dot_dimension_numbers<[1], [0], [0], [1], [0, 0, 1, 1], [], []>} : vector<80x65xbf16>, vector<65x1056xbf16>, vector<80x1056xf32> -> vector<80x1056xf32>
    %26 = tpu.iota {dimensions = array<i32: 0>} : vector<80x16xi32>
    %27 = tpu.iota {dimensions = array<i32: 1>} : vector<80x16xi32>
    %c5_i32 = arith.constant 5 : i32
    %28 = vector.broadcast %c5_i32 : i32 to vector<80x16xi32>
    %29 = arith.muli %27, %28 : vector<80x16xi32>
    %30 = arith.cmpi sge, %26, %29 : vector<80x16xi32>
    %c5_i32_18 = arith.constant 5 : i32
    %31 = vector.broadcast %c5_i32_18 : i32 to vector<80x16xi32>
    %32 = arith.addi %29, %31 : vector<80x16xi32>
    %33 = arith.cmpi slt, %26, %32 : vector<80x16xi32>
    %34 = arith.andi %30, %33 : vector<80x16xi1>
    %cst_19 = arith.constant 1.000000e+00 : f32
    %cst_20 = arith.constant 0.000000e+00 : f32
    %35 = vector.broadcast %cst_19 : f32 to vector<80x16xf32>
    %36 = vector.broadcast %cst_20 : f32 to vector<80x16xf32>
    %37 = arith.select %34, %35, %36 : vector<80x16xi1>, vector<80x16xf32>
    %38 = tpu.iota {dimensions = array<i32: 1>} : vector<32x1024xi32>
    %39 = tpu.iota {dimensions = array<i32: 0>} : vector<32x1024xi32>
    %c32_i32 = arith.constant 32 : i32
    %40 = vector.broadcast %c32_i32 : i32 to vector<32x1024xi32>
    %41 = arith.muli %39, %40 : vector<32x1024xi32>
    %42 = arith.cmpi sge, %38, %41 : vector<32x1024xi32>
    %c32_i32_21 = arith.constant 32 : i32
    %43 = vector.broadcast %c32_i32_21 : i32 to vector<32x1024xi32>
    %44 = arith.addi %41, %43 : vector<32x1024xi32>
    %45 = arith.cmpi slt, %38, %44 : vector<32x1024xi32>
    %46 = arith.andi %42, %45 : vector<32x1024xi1>
    %cst_22 = arith.constant 1.000000e+00 : f32
    %cst_23 = arith.constant 0.000000e+00 : f32
    %47 = vector.broadcast %cst_22 : f32 to vector<32x1024xf32>
    %48 = vector.broadcast %cst_23 : f32 to vector<32x1024xf32>
    %49 = arith.select %46, %47, %48 : vector<32x1024xi1>, vector<32x1024xf32>
    %cst_24 = arith.constant dense<0.000000e+00> : vector<80x32xf32>
    %50 = tpu.matmul %37, %5, %cst_24 {dimension_numbers = #tpu.dot_dimension_numbers<[1], [0], [0], [1], [0, 0, 1, 1], [], []>} : vector<80x16xf32>, vector<16x32xf32>, vector<80x32xf32> -> vector<80x32xf32>
    %cst_25 = arith.constant dense<0.000000e+00> : vector<80x1024xf32>
    %51 = tpu.matmul %50, %49, %cst_25 {dimension_numbers = #tpu.dot_dimension_numbers<[1], [0], [0], [1], [0, 0, 1, 1], [], []>} : vector<80x32xf32>, vector<32x1024xf32>, vector<80x1024xf32> -> vector<80x1024xf32>
    %52 = vector.extract_strided_slice %25 {offsets = [0, 0], sizes = [80, 1024], strides = [1, 1]} : vector<80x1056xf32> to vector<80x1024xf32>
    %53 = arith.mulf %51, %52 : vector<80x1024xf32>
    %54 = vector.extract_strided_slice %53 {offsets = [0, 0], sizes = [80, 128], strides = [1, 1]} : vector<80x1024xf32> to vector<80x128xf32>
    %55 = vector.extract_strided_slice %53 {offsets = [0, 128], sizes = [80, 128], strides = [1, 1]} : vector<80x1024xf32> to vector<80x128xf32>
    %56 = vector.extract_strided_slice %53 {offsets = [0, 256], sizes = [80, 128], strides = [1, 1]} : vector<80x1024xf32> to vector<80x128xf32>
    %57 = vector.extract_strided_slice %53 {offsets = [0, 384], sizes = [80, 128], strides = [1, 1]} : vector<80x1024xf32> to vector<80x128xf32>
    %58 = vector.extract_strided_slice %53 {offsets = [0, 512], sizes = [80, 128], strides = [1, 1]} : vector<80x1024xf32> to vector<80x128xf32>
    %59 = vector.extract_strided_slice %53 {offsets = [0, 640], sizes = [80, 128], strides = [1, 1]} : vector<80x1024xf32> to vector<80x128xf32>
    %60 = vector.extract_strided_slice %53 {offsets = [0, 768], sizes = [80, 128], strides = [1, 1]} : vector<80x1024xf32> to vector<80x128xf32>
    %61 = vector.extract_strided_slice %53 {offsets = [0, 896], sizes = [80, 128], strides = [1, 1]} : vector<80x1024xf32> to vector<80x128xf32>
    %62 = arith.addf %54, %55 : vector<80x128xf32>
    %63 = arith.addf %56, %57 : vector<80x128xf32>
    %64 = arith.addf %58, %59 : vector<80x128xf32>
    %65 = arith.addf %60, %61 : vector<80x128xf32>
    %66 = arith.addf %62, %63 : vector<80x128xf32>
    %67 = arith.addf %64, %65 : vector<80x128xf32>
    %68 = arith.addf %66, %67 : vector<80x128xf32>
    %69 = vector.extract_strided_slice %68 {offsets = [0, 0], sizes = [80, 64], strides = [1, 1]} : vector<80x128xf32> to vector<80x64xf32>
    %70 = vector.extract_strided_slice %68 {offsets = [0, 64], sizes = [80, 64], strides = [1, 1]} : vector<80x128xf32> to vector<80x64xf32>
    %71 = arith.addf %69, %70 : vector<80x64xf32>
    %72 = vector.extract_strided_slice %71 {offsets = [0, 0], sizes = [80, 32], strides = [1, 1]} : vector<80x64xf32> to vector<80x32xf32>
    %73 = vector.extract_strided_slice %71 {offsets = [0, 32], sizes = [80, 32], strides = [1, 1]} : vector<80x64xf32> to vector<80x32xf32>
    %74 = arith.addf %72, %73 : vector<80x32xf32>
    %75 = vector.extract_strided_slice %25 {offsets = [0, 1024], sizes = [80, 32], strides = [1, 1]} : vector<80x1056xf32> to vector<80x32xf32>
    %76 = arith.addf %74, %75 : vector<80x32xf32>
    %77 = math.absf %76 : vector<80x32xf32>
    %78 = tpu.iota {dimensions = array<i32: 1>} : vector<16x80xi32>
    %79 = tpu.iota {dimensions = array<i32: 0>} : vector<16x80xi32>
    %c5_i32_26 = arith.constant 5 : i32
    %80 = vector.broadcast %c5_i32_26 : i32 to vector<16x80xi32>
    %81 = arith.muli %79, %80 : vector<16x80xi32>
    %82 = arith.cmpi sge, %78, %81 : vector<16x80xi32>
    %c5_i32_27 = arith.constant 5 : i32
    %83 = vector.broadcast %c5_i32_27 : i32 to vector<16x80xi32>
    %84 = arith.addi %81, %83 : vector<16x80xi32>
    %85 = arith.cmpi slt, %78, %84 : vector<16x80xi32>
    %86 = arith.andi %82, %85 : vector<16x80xi1>
    %cst_28 = arith.constant 1.000000e+00 : f32
    %cst_29 = arith.constant 0.000000e+00 : f32
    %87 = vector.broadcast %cst_28 : f32 to vector<16x80xf32>
    %88 = vector.broadcast %cst_29 : f32 to vector<16x80xf32>
    %89 = arith.select %86, %87, %88 : vector<16x80xi1>, vector<16x80xf32>
    %c0_30 = arith.constant 0 : index
    %c0_31 = arith.constant 0 : index
    %90 = vector.load %arg1[%c0_30, %c0_31] : memref<80x1xf32, #tpu.memory_space<vmem>>, vector<80x1xf32>
    %91 = vector.broadcast %90 : vector<80x1xf32> to vector<80x32xf32>
    %92 = arith.mulf %91, %77 : vector<80x32xf32>
    %cst_32 = arith.constant dense<0.000000e+00> : vector<16x32xf32>
    %93 = tpu.matmul %89, %92, %cst_32 {dimension_numbers = #tpu.dot_dimension_numbers<[1], [0], [0], [1], [0, 0, 1, 1], [], []>} : vector<16x80xf32>, vector<80x32xf32>, vector<16x32xf32> -> vector<16x32xf32>
    %94 = arith.addf %93, %6 : vector<16x32xf32>
    %cst_33 = arith.constant 0.000000e+00 : f32
    %95 = vector.broadcast %cst_33 : f32 to vector<16x32xf32>
    %96 = arith.cmpf ogt, %94, %95 : vector<16x32xf32>
    %cst_34 = arith.constant 0.000000e+00 : f32
    %97 = vector.broadcast %cst_34 : f32 to vector<16x32xf32>
    %98 = arith.minimumf %94, %97 : vector<16x32xf32>
    %99 = math.exp %98 : vector<16x32xf32>
    %cst_35 = arith.constant 1.000000e+00 : f32
    %100 = vector.broadcast %cst_35 : f32 to vector<16x32xf32>
    %101 = arith.subf %99, %100 : vector<16x32xf32>
    %102 = arith.select %96, %94, %101 : vector<16x32xi1>, vector<16x32xf32>
    %103 = arith.mulf %102, %16 : vector<16x32xf32>
    %cst_36 = arith.constant dense<0.000000e+00> : vector<16xf32>
    %104 = vector.multi_reduction <add>, %103, %cst_36 [1] : vector<16x32xf32> to vector<16xf32>
    %105 = vector.shape_cast %104 : vector<16xf32> to vector<16x1xf32>
    %106 = arith.addf %105, %17 : vector<16x1xf32>
    %c0_37 = arith.constant 0 : index
    %c0_38 = arith.constant 0 : index
    %107 = vector.load %arg8[%c0_37, %c0_38] : memref<16x1xf32, #tpu.memory_space<vmem>>, vector<16x1xf32>
    tpu.vector_store %arg8[%c0_37, %c0_38], %106 {strides = array<i32>} : memref<16x1xf32, #tpu.memory_space<vmem>>, vector<16x1xf32>,
    return
  }
  func.func @transform_0(%arg0: i32) -> (i32, i32) {
    %c0_i32 = arith.constant 0 : i32
    %c0_i32_0 = arith.constant 0 : i32
    return %arg0, %c0_i32 : i32, i32
  }
  func.func @transform_1(%arg0: i32) -> (i32, i32) {
    %c0_i32 = arith.constant 0 : i32
    %c0_i32_0 = arith.constant 0 : i32
    return %arg0, %c0_i32 : i32, i32
  }
  func.func @transform_2(%arg0: i32) -> (i32, i32) {
    %c0_i32 = arith.constant 0 : i32
    %c0_i32_0 = arith.constant 0 : i32
    return %arg0, %c0_i32 : i32, i32
  }
  func.func @transform_3(%arg0: i32) -> (i32, i32) {
    %c0_i32 = arith.constant 0 : i32
    %c0_i32_0 = arith.constant 0 : i32
    %c0_i32_1 = arith.constant 0 : i32
    return %c0_i32, %c0_i32_0 : i32, i32
  }
  func.func @transform_4(%arg0: i32) -> (i32, i32) {
    %c0_i32 = arith.constant 0 : i32
    %c0_i32_0 = arith.constant 0 : i32
    %c0_i32_1 = arith.constant 0 : i32
    return %c0_i32, %c0_i32_0 : i32, i32
  }
  func.func @transform_5(%arg0: i32) -> (i32, i32) {
    %c0_i32 = arith.constant 0 : i32
    %c0_i32_0 = arith.constant 0 : i32
    %c0_i32_1 = arith.constant 0 : i32
    return %c0_i32, %c0_i32_0 : i32, i32
  }
  func.func @transform_6(%arg0: i32) -> (i32, i32) {
    %c0_i32 = arith.constant 0 : i32
    %c0_i32_0 = arith.constant 0 : i32
    %c0_i32_1 = arith.constant 0 : i32
    return %c0_i32, %c0_i32_0 : i32, i32
  }
  func.func @transform_7(%arg0: i32) -> (i32, i32) {
    %c0_i32 = arith.constant 0 : i32
    %c0_i32_0 = arith.constant 0 : i32
    return %arg0, %c0_i32 : i32, i32
  }
}

</mosaic_0001>

<bundles_post_ra>
// kernel: tpu_custom_call.1
= control target key start
LH: loop header
LB: loop body
LE: loop exit
PB: predicated region body
PF: predicated region fallthrough
CT: control target
= control target key end

     0   :  { %12 = vsyncpa [#allocation3], 0  ;;  %s2939_s24 = smov [#allocation2]   ;;  %s4113_s0 = inlined_call_operand.vmem [shape: f32[80,1], index: 0, kind: input, shape index: {}]   ;;  %s4114_s1 = inlined_call_operand.vmem [shape: bf16[16,98], index: 1, kind: input, shape index: {}]   ;;  %s4115_s2 = inlined_call_operand.vmem [shape: bf16[80,12], index: 2, kind: input, shape index: {}]   ;;  %s4116_s3 = inlined_call_operand.vmem [shape: bf16[98,128], index: 3, kind: input, shape index: {}]   ;;  %s4117_s4 = inlined_call_operand.vmem [shape: f32[65,33], index: 4, kind: input, shape index: {}]   ;;  %s4118_s5 = inlined_call_operand.vmem [shape: bf16[12,65], index: 5, kind: input, shape index: {}]   ;;  %s4119_s6 = inlined_call_operand.hbm [shape: bf16[65,1056], index: 6, kind: input, shape index: {}]   ;;  %s4120_s7 = inlined_call_operand.vmem [shape: f32[16,1], index: 7, kind: output, shape index: {}]  }
   0x1   :  { %s30_s25 = sshll.u32 %s2939_s24, 4  ;;  %s31_s25 = int_to_ptr.vmem [resolvable:$true] %s30_s25 }
   0x2   :  { %s2925_s26 = scalar_lea.vmem %s31_s25, 5184  ;;  %p2930_p1 = scmp.lt.s32.totalorder %s31_s25, %s31_s25 }
   0x3   :  { %p2926_p0 = scmp.ne.s32.totalorder %s31_s25, %s2925_s26  ;;  %p2931_p2 = scmp.lt.s32.totalorder %s2925_s26, %s2925_s26 }
   0x5   :  { %p2932_p3 = por %p2931_p2, %p2930_p1 }
   0x7   :  { %p2933_p4 = pnand %p2932_p3, %p2926_p0 }
   0x9   :  { %2936 = shalt.err (!%p2933_p4)
}
   0xa   :  { %s2940_s27 = smov 576   ;;  %s2941_s28 = smov 36  }
   0xb   :  { %36 = dma.hbm_to_vmem [thread:$0]  %s4119_s6, 5184, %s31_s25, [#allocation3], %s2940_s27, %s2940_s27, %s2941_s28  }
   0xc   :  { %2937 = dma.done.wait [#allocation3], 5184  }
   0xd   :  { %2938 = vsyncadd [#allocation3], 4294962112  ;;  %v4123_v0 = vmov 0.0   ;;  %vm2943_vm0 = vmmov 0   ;;  %v2944_v1 = vmov 0   ;;  %vm104_vm1 = vcmask 1040384  }
   0xe   :  { %2696 = vmatprep.subr.bf16.mxu0 %v4123_v0  ;;  %2710 = vmatprep.mubr.msk.bf16.mxu0 %vm2943_vm0, %v4123_v0  ;;  %v2838_v2 = vld [vmem:[%s4116_s3 + $0x30] ss:$0 sps:$4 sm:$0x11]   ;;  %v2839_v4 = vld [vmem:[%s4116_s3 + $0x28] sm:$0xff]   ;;  %v2840_v5 = vld [vmem:[%s4116_s3 + $0x20] sm:$0xff]   ;;  %vm100_vm2 = vcmask 801792  }
   0xf   :  { %2836 = vset.pattern.permute.xlu1 %v2944_v1  ;;  %2837 = vset.pattern.permute.xlu0 %v2944_v1  ;;  %v106_v3 = vsel %vm104_vm1, %v2838_v2, 0  ;;  %v2841_v6 = vld [vmem:[%s4116_s3 + $0x18] sm:$0xff]   ;;  %v2842_v7 = vld [vmem:[%s4116_s3 + $0x10] sm:$0xff]   ;;  %v2843_v8 = vld [vmem:[%s4116_s3 + $0x8] sm:$0xff]   ;;  %s2945_s13 = smov 64   ;;  %v3069_v25 = vsel %vm104_vm1, 65535, %v2944_v1 }
  0x10   :  { %2697 = vmatpush3.bf16.msra.mxu0 %v106_v3  ;;  %v2844_v9 = vld [vmem:[%s4116_s3] sm:$0xff]   ;;  %v158_v11 = vld [vmem:[%s4117_s4 + $0x38] sm:$0xff]  ;;  %v157_v12 = vld [vmem:[%s4117_s4 + $0x30] sm:$0xff]  ;;  %vm170_vm3 = vcmask 523264   ;;  %vm310_vm4 = vcmask 1045504   ;;  %vm294_vm5 = vcmask 97280  }
  0x11   :  { %2698 = vmatprep.subr.bf16.mxu0 %v4123_v0  ;;  %v2845_v10 = vld [vmem:[%s4114_s1] sm:$0xff]   ;;  %2714 = vmatprep.subr.mxu1 %v158_v11  ;;  %v156_v13 = vld [vmem:[%s4117_s4 + $0x28] sm:$0xff]  ;;  %v154_v15 = vld [vmem:[%s4117_s4 + $0x18] sm:$0xff]  ;;  %vm654_vm6 = vcmask 531456   ;;  %vm1302_vm10 = vcmask 130048  }
  0x12   :  { %2715 = vmatpush3.msra.mxu1 %v158_v11  ;;  %v155_v14 = vld [vmem:[%s4117_s4 + $0x20] sm:$0xff]  ;;  %v153_v16 = vld [vmem:[%s4117_s4 + $0x10] sm:$0xff]  ;;  %v152_v17 = vld [vmem:[%s4117_s4 + $0x8] sm:$0xff] }
  0x13   :  { %2716 = vmatprep.subr.mxu1 %v157_v12  ;;  %v151_v18 = vld [vmem:[%s4117_s4] sm:$0xff]  ;;  %v2859_v32 = vld [vmem:[#allocation2 + $0xd8] ss:$36 sps:$4 sm:$0xff]   ;;  %v443_v33 = vld [vmem:[#allocation2 + $0x128] sm:$0x11] }
  0x14   :  { %2699 = vmatpush3.bf16.msra.mxu0 %v2839_v4  ;;  %2717 = vmatpush3.msra.mxu1 %v157_v12  ;;  %v442_v26 = vld [vmem:[#allocation2 + $0x120] sm:$0x11]  ;;  %v2521_v35 = vcombine.high %v443_v33, %v443_v33  ;;  %v2520_v37 = vcombine.low %v443_v33, %v443_v33  ;;  %v2848_v45 = vld [vmem:[%s4115_s2 + $0x8] sm:$0xff]   ;;  %v2849_v46 = vld [vmem:[%s4115_s2 + $0x10] sm:$0xff]  }
  0x15   :  { %2700 = vmatprep.subr.bf16.mxu0 %v4123_v0  ;;  %2718 = vmatprep.subr.mxu1 %v156_v13  ;;  %v2518_v27 = vcombine.low %v442_v26, %v442_v26  ;;  %v2519_v28 = vcombine.high %v442_v26, %v442_v26  ;;  %v2861_v31 = vld [vmem:[#allocation2 + $0xdc] ss:$36 sps:$4 sm:$0xff]   ;;  %v2858_v43 = vld [vmem:[#allocation2 + $0xe4] ss:$36 sps:$4 sm:$0xff]   ;;  %v2867_v51 = vld [vmem:[#allocation2 + $0x94] ss:$36 sps:$4 sm:$0xff]  }
  0x16   :  { %2719 = vmatpush3.msra.mxu1 %v156_v13  ;;  %v2846_v34 = vld [vmem:[%s4118_s5] sm:$0x3f]   ;;  %v682_v39 = vand.u32 %v2521_v35, %v3069_v25  ;;  %v679_v42 = vand.u32 %v2520_v37, %v3069_v25  ;;  %v2850_v47 = vld [vmem:[%s4115_s2 + $0x18] sm:$0xff]   ;;  %v2865_v52 = vld [vmem:[#allocation2 + $0x90] ss:$36 sps:$4 sm:$0xff]   ;;  %s2947_s5 = smov 96  }
  0x17   :  { %2720 = vmatprep.subr.mxu1 %v155_v14  ;;  %v676_v29 = vand.u32 %v2519_v28, %v3069_v25  ;;  %v673_v30 = vand.u32 %v2518_v27, %v3069_v25  ;;  %v312_v38 = vsel %vm310_vm4, %v2846_v34, 0  ;;  %v2847_v41 = vld [vmem:[%s4115_s2] sm:$0xff]   ;;  %v2862_v50 = vld [vmem:[#allocation2 + $0x98] ss:$36 sps:$4 sm:$0xff]   ;;  %v2868_v54 = vld [vmem:[#allocation2 + $0x50] ss:$36 sps:$4 sm:$0xff]  }
  0x18   :  { %2701 = vmatpush3.bf16.msra.mxu0 %v2840_v5  ;;  %2721 = vmatpush3.msra.mxu1 %v155_v14  ;;  %v2856_v44 = vld [vmem:[#allocation2 + $0xe0] ss:$36 sps:$4 sm:$0xff]   ;;  %v2870_v53 = vld [vmem:[#allocation2 + $0x54] ss:$36 sps:$4 sm:$0xff]   ;;  %v2873_v55 = vld [vmem:[#allocation2 + $0x4c] ss:$36 sps:$4 sm:$0xff]  }
  0x19   :  { %2702 = vmatprep.subr.bf16.mxu0 %v4123_v0  ;;  %2722 = vmatprep.subr.mxu1 %v154_v15  ;;  %v2851_v48 = vld [vmem:[%s4115_s2 + $0x20] sm:$0xff]   ;;  %v2871_v56 = vld [vmem:[#allocation2 + $0x48] ss:$36 sps:$4 sm:$0xff]   ;;  %v445_v60 = vld [vmem:[#allocation2 + $0x138] sm:$0x11] }
  0x1a   :  { %2723 = vmatpush3.msra.mxu1 %v154_v15  ;;  %v2864_v49 = vld [vmem:[#allocation2 + $0x9c] ss:$36 sps:$4 sm:$0xff]   ;;  %v2876_v57 = vld [vmem:[#allocation2 + $0xc] ss:$36 sps:$4 sm:$0xff]   ;;  %v2879_v59 = vld [vmem:[#allocation2 + $0x4] ss:$36 sps:$4 sm:$0xff]   ;;  %v2525_v62 = vcombine.high %v445_v60, %v445_v60 }
  0x1b   :  { %2724 = vmatprep.subr.mxu1 %v153_v16  ;;  %v2874_v58 = vld [vmem:[#allocation2 + $0x8] ss:$36 sps:$4 sm:$0xff]   ;;  %v2877_v61 = vld [vmem:[#allocation2] ss:$36 sps:$4 sm:$0xff]   ;;  %v444_v2 = vld [vmem:[#allocation2 + $0x130] sm:$0x11] }
  0x1c   :  { %2703 = vmatpush3.bf16.msra.mxu0 %v2841_v6  ;;  %2725 = vmatpush3.msra.mxu1 %v153_v16  ;;  %v694_v63 = vand.u32 %v2525_v62, %v3069_v25  ;;  %v2523_v3 = vcombine.high %v444_v2, %v444_v2  ;;  %v2522_v11 = vcombine.low %v444_v2, %v444_v2  ;;  %v2882_v27 = vld [vmem:[#allocation2 + $0xf0] ss:$36 sps:$4 sm:$0xff]   ;;  %v2885_v34 = vld [vmem:[#allocation2 + $0xa8] ss:$36 sps:$4 sm:$0xff]  }
  0x1d   :  { %2704 = vmatprep.subr.bf16.mxu0 %v4123_v0  ;;  %2726 = vmatprep.subr.mxu1 %v152_v17  ;;  %v2887_v28 = vld [vmem:[#allocation2 + $0xac] ss:$36 sps:$4 sm:$0xff]  }
  0x1e   :  { %2727 = vmatpush3.msra.mxu1 %v152_v17  ;;  %v688_v4 = vand.u32 %v2523_v3, %v3069_v25  ;;  %v2884_v17 = vld [vmem:[#allocation2 + $0xf4] ss:$36 sps:$4 sm:$0xff]  }
  0x1f   :  { %2728 = vmatprep.subr.mxu1 %v151_v18 }
  0x20   :  { %2705 = vmatpush3.bf16.msra.mxu0 %v2842_v7  ;;  %2729 = vmatpush3.msra.mxu1 %v151_v18 }
  0x21   :  { %2706 = vmatprep.subr.bf16.mxu0 %v4123_v0  ;;  %2733 = vmatprep.subr.bf16.mxu1 %v4123_v0 }
  0x24   :  { %2707 = vmatpush3.bf16.msra.mxu0 %v2843_v8 }
  0x25   :  { %2708 = vmatprep.subr.bf16.mxu0 %v4123_v0 }
  0x28   :  { %2709 = vmatpush3.bf16.msra.mxu0 %v2844_v9  ;;  %v2524_v9 = vcombine.low %v445_v60, %v445_v60 }
  0x29   :  { %705 = vmatprep.subr.bf16.mxu0 %v676_v29 }
  0x2a   :  { %v691_v15 = vand.u32 %v2524_v9, %v3069_v25  ;;  %v2909_v9 = vld [vmem:[#allocation2 + $0xf8] ss:$36 sps:$4 sm:$0xff]  }
  0x2b   :  { %2711 = vmatmul.mubr.msk.bf16.vlgmr.msra.gmra.mxu0 %vm100_vm2, %v2845_v10 }
  0x2c   :  { %731 = vmatprep.mubr.bf16.mxu0 %v2944_v1  ;;  %706 = vmatpush1.bf16.msra.mxu0 %v673_v30  ;;  %v2896_v30 = vld [vmem:[#allocation2 + $0xe8] ss:$36 sps:$4 sm:$0xff]  }
  0x2d   :  { %707 = vmatprep.subr.bf16.mxu0 %v2861_v31 }
  0x30   :  { %708 = vmatpush1.bf16.msra.mxu0 %v2859_v32 }
  0x31   :  { %709 = vmatprep.subr.bf16.mxu0 %v2867_v51  ;;  %v2902_v51 = vld [vmem:[#allocation2 + $0x58] ss:$36 sps:$4 sm:$0xff]  }
  0x34   :  { %710 = vmatpush1.bf16.msra.mxu0 %v2865_v52  ;;  %v2907_v52 = vld [vmem:[#allocation2 + $0x14] ss:$36 sps:$4 sm:$0xff]  }
  0x35   :  { %711 = vmatprep.subr.bf16.mxu0 %v2873_v55  ;;  %v2905_v55 = vld [vmem:[#allocation2 + $0x10] ss:$36 sps:$4 sm:$0xff]  }
  0x38   :  { %712 = vmatpush1.bf16.msra.mxu0 %v2871_v56 }
  0x39   :  { %713 = vmatprep.subr.bf16.mxu0 %v2879_v59 }
  0x3c   :  { %714 = vmatpush1.bf16.msra.mxu0 %v2877_v61 }
  0x3d   :  { %871 = vmatprep.subr.bf16.mxu0 %v688_v4 }
  0xeb   :  { %v3053_v19 = vpop.f32.mrf.mxu0 }
  0xec   :  { %4132 = vst [vmem:[#allocation5_spill] sm:$0xff] %v3053_v19  ;;  %v3056_v20 = vmax.f32 %v3053_v19, 0.0 }
  0xed   :  { %v2712_v21 = vpop.f32.mrf.mxu0 }
  0xee   :  { %166 = vrot.lane.b32.xlu0 %v3056_v20, %s2945_s13  ;;  %v685_v21 = vand.u32 %v2522_v11, %v3069_v25  ;;  %v2912_v11 = vld [vmem:[#allocation2 + $0x20] ss:$36 sps:$4 sm:$0xff]  }
  0xef   :  { %v3060_v22 = vpop.f32.mrf.mxu0 }
  0xf0   :  { %4133 = vst [vmem:[#allocation6_spill] sm:$0xff] %v3060_v22  ;;  %v3063_v23 = vmax.f32 %v3060_v22, 0.0 }
  0xf1   :  { %v2713_v24 = vpop.f32.mrf.mxu0 }
  0xf2   :  { %168 = vrot.lane.b32.xlu0 %v3063_v23, %s2945_s13  ;;  %v2898_v24 = vld [vmem:[#allocation2 + $0xec] ss:$36 sps:$4 sm:$0xff]  }
 0x160   :  { %v167_v36 = vpop.permute.xlu0 %166 }
 0x161   :  { %2730 = vmatprep.mubr.msk.f32.mxu1 %vm170_vm3, %v167_v36  ;;  %v2890_v36 = vld [vmem:[#allocation2 + $0x64] ss:$36 sps:$4 sm:$0xff]  }
 0x164   :  { %v169_v40 = vpop.permute.xlu0 %168 }
 0x165   :  { %2731 = vmatmul.mubr.msk.f32.vlgmr.msra.gmra.mxu1 %vm170_vm3, %v169_v40 }
 0x166   :  { %2734 = vmatpush3.bf16.msra.mxu1 %v312_v38  ;;  %2735 = vmatprep.mubr.msk.bf16.mxu1 %vm2943_vm0, %v4123_v0  ;;  %v2901_v38 = vld [vmem:[#allocation2 + $0xa4] ss:$36 sps:$4 sm:$0xff]  }
 0x167   :  { %788 = vmatprep.subr.bf16.mxu1 %v682_v39  ;;  %v2899_v39 = vld [vmem:[#allocation2 + $0xa0] ss:$36 sps:$4 sm:$0xff]  }
 0x169   :  { %2736 = vmatmul.mubr.msk.bf16.vlgmr.msra.gmra.mxu1 %vm294_vm5, %v2847_v41  ;;  %v2888_v41 = vld [vmem:[#allocation2 + $0x60] ss:$36 sps:$4 sm:$0xff]  }
 0x16a   :  { %2739 = vmatprep.mubr.msk.bf16.mxu1 %vm2943_vm0, %v4123_v0  ;;  %789 = vmatpush1.bf16.msra.mxu1 %v679_v42  ;;  %v2904_v42 = vld [vmem:[#allocation2 + $0x5c] ss:$36 sps:$4 sm:$0xff]  }
 0x16b   :  { %790 = vmatprep.subr.bf16.mxu1 %v2858_v43  ;;  %v2893_v43 = vld [vmem:[#allocation2 + $0x1c] ss:$36 sps:$4 sm:$0xff]  }
 0x16e   :  { %791 = vmatpush1.bf16.msra.mxu1 %v2856_v44 }
 0x16f   :  { %792 = vmatprep.subr.bf16.mxu1 %v2864_v49 }
 0x171   :  { %2740 = vmatmul.mubr.msk.bf16.gmra.mxu1 %vm294_vm5, %v2848_v45 }
 0x172   :  { %2743 = vmatprep.mubr.msk.bf16.mxu1 %vm2943_vm0, %v4123_v0  ;;  %793 = vmatpush1.bf16.msra.mxu1 %v2862_v50 }
 0x173   :  { %794 = vmatprep.subr.bf16.mxu1 %v2870_v53 }
 0x176   :  { %795 = vmatpush1.bf16.msra.mxu1 %v2868_v54 }
 0x177   :  { %796 = vmatprep.subr.bf16.mxu1 %v2876_v57 }
 0x179   :  { %2744 = vmatmul.mubr.msk.bf16.gmra.mxu1 %vm294_vm5, %v2849_v46 }
 0x17a   :  { %2747 = vmatprep.mubr.msk.bf16.mxu1 %vm2943_vm0, %v4123_v0  ;;  %797 = vmatpush1.bf16.msra.mxu1 %v2874_v58 }
 0x17b   :  { %954 = vmatprep.subr.bf16.mxu1 %v694_v63 }
 0x181   :  { %2748 = vmatmul.mubr.msk.bf16.gmra.mxu1 %vm294_vm5, %v2850_v47 }
 0x182   :  { %2751 = vmatprep.mubr.msk.bf16.mxu1 %vm2943_vm0, %v4123_v0 }
 0x189   :  { %2752 = vmatmul.mubr.msk.bf16.gmra.mxu1 %vm294_vm5, %v2851_v48  ;;  %v2891_v48 = vld [vmem:[#allocation2 + $0x18] ss:$36 sps:$4 sm:$0xff]  }
 0x18a   :  { %814 = vmatprep.mubr.bf16.mxu1 %v2944_v1 }
 0x225   :  { %v3111_v5 = vpop.f32.mrf.mxu1 }
 0x226   :  { %4134 = vst [vmem:[#allocation7_spill] sm:$0xff] %v3111_v5 }
 0x227   :  { %v3113_v6 = vpop.f32.mrf.mxu1 }
 0x228   :  { %4135 = vst [vmem:[#allocation8_spill] sm:$0xff] %v3113_v6 }
 0x229   :  { %v348_v7 = vpop.f32.mrf.mxu1 }
 0x22a   :  { %v387_v12 = vmax.f32 %v348_v7, 0.0  ;;  %v2908_v7 = vld [vmem:[#allocation2 + $0x140] ss:$0 sps:$4 sm:$0x11]  }
 0x22b   :  { %v2737_v8 = vpop.f32.mrf.mxu1 }
 0x22c   :  { %v697_v8 = vand.u32 %v2908_v7, %v3069_v25  ;;  %v2910_v25 = vld [vmem:[#allocation2 + $0xb0] ss:$36 sps:$4 sm:$0xff]  }
 0x22d   :  { %v351_v10 = vpop.f32.mrf.mxu1 }
 0x22e   :  { %v388_v13 = vmax.f32 %v351_v10, 0.0 }
 0x22f   :  { %v2738_v14 = vpop.f32.mrf.mxu1 }
 0x230   :  { %v3116_v16 = vpack.c.bf16 %v388_v13, %v387_v12 }
 0x231   :  { %v356_v18 = vpop.f32.mrf.mxu1 }
 0x232   :  { %2527 = vmatmul.mubr.msk.bf16.vlgmr.msra.gmra.mxu0 %vm654_vm6, %v3116_v16  ;;  %2532 = vmatmul.mubr.msk.bf16.vlgmr.msra.gmra.mxu1 %vm654_vm6, %v3116_v16  ;;  %v389_v31 = vmax.f32 %v356_v18, 0.0 }
 0x233   :  { %955 = vmatpush1.bf16.msra.mxu1 %v691_v15  ;;  %v2741_v26 = vpop.f32.mrf.mxu1  ;;  %741 = vmatprep.mubr.bf16.mxu0 %v2944_v1 }
 0x234   :  { %956 = vmatprep.subr.bf16.mxu1 %v2884_v17  ;;  %824 = vmatprep.mubr.bf16.mxu1 %v2944_v1 }
 0x235   :  { %v359_v29 = vpop.f32.mrf.mxu1  ;;  %872 = vmatpush1.bf16.msra.mxu0 %v685_v21 }
 0x236   :  { %v390_v32 = vmax.f32 %v359_v29, 0.0  ;;  %873 = vmatprep.subr.bf16.mxu0 %v2898_v24 }
 0x237   :  { %957 = vmatpush1.bf16.msra.mxu1 %v2882_v27  ;;  %v2742_v33 = vpop.f32.mrf.mxu1 }
 0x238   :  { %v3125_v35 = vpack.c.bf16 %v390_v32, %v389_v31  ;;  %958 = vmatprep.subr.bf16.mxu1 %v2887_v28 }
 0x239   :  { %v364_v37 = vpop.f32.mrf.mxu1  ;;  %874 = vmatpush1.bf16.msra.mxu0 %v2896_v30 }
 0x23a   :  { %2528 = vmatmul.mubr.msk.bf16.gmra.mxu0 %vm654_vm6, %v3125_v35  ;;  %2533 = vmatmul.mubr.msk.bf16.gmra.mxu1 %vm654_vm6, %v3125_v35  ;;  %v391_v45 = vmax.f32 %v364_v37, 0.0 }
 0x23b   :  { %959 = vmatpush1.bf16.msra.mxu1 %v2885_v34  ;;  %v2745_v40 = vpop.f32.mrf.mxu1  ;;  %751 = vmatprep.mubr.bf16.mxu0 %v2944_v1 }
 0x23c   :  { %960 = vmatprep.subr.bf16.mxu1 %v2890_v36  ;;  %834 = vmatprep.mubr.bf16.mxu1 %v2944_v1 }
 0x23d   :  { %v367_v44 = vpop.f32.mrf.mxu1  ;;  %875 = vmatprep.subr.bf16.mxu0 %v2901_v38 }
 0x23e   :  { %v392_v46 = vmax.f32 %v367_v44, 0.0  ;;  %876 = vmatpush1.bf16.msra.mxu0 %v2899_v39 }
 0x23f   :  { %961 = vmatpush1.bf16.msra.mxu1 %v2888_v41  ;;  %v2746_v47 = vpop.f32.mrf.mxu1  ;;  %877 = vmatprep.subr.bf16.mxu0 %v2904_v42  ;;  %v4121_v42 = vmov 1.0  }
 0x240   :  { %v3133_v49 = vpack.c.bf16 %v392_v46, %v391_v45  ;;  %962 = vmatprep.subr.bf16.mxu1 %v2893_v43 }
 0x241   :  { %v372_v50 = vpop.f32.mrf.mxu1 }
 0x242   :  { %2529 = vmatmul.mubr.msk.bf16.gmra.mxu0 %vm654_vm6, %v3133_v49  ;;  %2534 = vmatmul.mubr.msk.bf16.gmra.mxu1 %vm654_vm6, %v3133_v49  ;;  %v393_v56 = vmax.f32 %v372_v50, 0.0 }
 0x243   :  { %963 = vmatpush1.bf16.msra.mxu1 %v2891_v48  ;;  %v2749_v53 = vpop.f32.mrf.mxu1  ;;  %761 = vmatprep.mubr.bf16.mxu0 %v2944_v1 }
 0x244   :  { %2785 = vmatprep.subr.mxu1 %v3063_v23  ;;  %844 = vmatprep.mubr.bf16.mxu1 %v2944_v1 }
 0x245   :  { %v375_v54 = vpop.f32.mrf.mxu1  ;;  %878 = vmatpush1.bf16.msra.mxu0 %v2902_v51 }
 0x246   :  { %v394_v57 = vmax.f32 %v375_v54, 0.0  ;;  %879 = vmatprep.subr.bf16.mxu0 %v2907_v52 }
 0x247   :  { %v2750_v58 = vpop.f32.mrf.mxu1 }
 0x248   :  { %v3142_v59 = vpack.c.bf16 %v394_v57, %v393_v56  ;;  %v4143_v56 = vmov 0  ;;  %v4145_v57 = vmov 0  ;;  %v4147_v58 = vmov 0 }
 0x249   :  { %v380_v60 = vpop.f32.mrf.mxu1  ;;  %880 = vmatpush1.bf16.msra.mxu0 %v2905_v55  ;;  %v4141_v55 = vmov 0 }
 0x24a   :  { %2530 = vmatmul.mubr.msk.bf16.gmra.mxu0 %vm654_vm6, %v3142_v59  ;;  %2535 = vmatmul.mubr.msk.bf16.gmra.mxu1 %vm654_vm6, %v3142_v59  ;;  %v395_v63 = vmax.f32 %v380_v60, 0.0  ;;  %v4151_v60 = vmov 0 }
 0x24b   :  { %v2753_v61 = vpop.f32.mrf.mxu1  ;;  %771 = vmatprep.mubr.bf16.mxu0 %v2944_v1  ;;  %854 = vmatprep.mubr.bf16.mxu1 %v2944_v1 }
 0x24c   :  { %2755 = vmatprep.subr.bf16.mxu0 %v4123_v0  ;;  %v4153_v61 = vmov 0 }
 0x24d   :  { %v383_v62 = vpop.f32.mrf.mxu1 }
 0x24e   :  { %v396_v2 = vmax.f32 %v383_v62, 0.0 }
 0x24f   :  { %v2754_v3 = vpop.f32.mrf.mxu1 }
 0x250   :  { %v3151_v4 = vpack.c.bf16 %v396_v2, %v395_v63 }
 0x252   :  { %2531 = vmatmul.mubr.msk.bf16.gmra.mxu0 %vm654_vm6, %v3151_v4  ;;  %2536 = vmatmul.mubr.msk.bf16.gmra.mxu1 %vm654_vm6, %v3151_v4 }
 0x253   :  { %897 = vmatprep.mubr.bf16.mxu0 %v2944_v1  ;;  %980 = vmatprep.mubr.bf16.mxu1 %v2944_v1 }
 0x25a   :  { %2537 = vmatmul.mubr.msk.bf16.vlgmr.msra.gmra.mxu0 %vm654_vm6, %v3116_v16  ;;  %2542 = vmatmul.mubr.msk.bf16.vlgmr.msra.gmra.mxu1 %vm654_vm6, %v3116_v16 }
 0x25b   :  { %2786 = vmatpush3.msra.mxu1 %v3063_v23  ;;  %907 = vmatprep.mubr.bf16.mxu0 %v2944_v1  ;;  %v1104_v23 = vlaneseq }
 0x25c   :  { %2787 = vmatprep.subr.mxu1 %v3056_v20  ;;  %990 = vmatprep.mubr.bf16.mxu1 %v2944_v1 }
 0x25d   :  { %2788 = vmatpush3.msra.mxu1 %v3056_v20  ;;  %2756 = vmatpush3.bf16.msra.mxu0 %v697_v8  ;;  %v2911_v20 = vld [vmem:[#allocation2 + $0x68] ss:$36 sps:$4 sm:$0xff]   ;;  %v3178_v10 = vand.u32 127, %v1104_v23  ;;  %v3190_v13 = vshrl.u32 %v1104_v23, 7 }
 0x25e   :  { %2757 = vmatprep.subr.bf16.mxu0 %v4123_v0 }
 0x25f   :  { %4136 = vst [vmem:[#allocation9_spill] sm:$0xff] %v3178_v10  ;;  %v3185_v12 = vmul.u32 5, %v3178_v10  ;;  %4137 = vst [vmem:[#allocation10_spill] sm:$0xff] %v3190_v13  ;;  %v3206_v15 = vadd.s32 8, %v3190_v13  ;;  %v3209_v17 = vadd.s32 16, %v3190_v13  ;;  %v3217_v21 = vadd.s32 24, %v3190_v13 }
 0x260   :  { %v1110_v24 = vadd.s32 40, %v3190_v13  ;;  %v1111_v26 = vadd.s32 48, %v3190_v13  ;;  %v1112_v29 = vadd.s32 56, %v3190_v13  ;;  %v1113_v30 = vadd.s32 64, %v3190_v13 }
 0x261   :  { %2758 = vmatpush3.bf16.msra.mxu0 %v2909_v9  ;;  %v3193_v14 = vadd.s32 5, %v3185_v12  ;;  %vm1118_vm7 = vcmp.ge.s32.totalorder %v3190_v13, %v3185_v12  ;;  %4138 = vst [vmem:[#allocation11_spill] sm:$0xff] %v3206_v15  ;;  %vm1119_vm11 = vcmp.ge.s32.totalorder %v3206_v15, %v3185_v12  ;;  %vm1120_vm13 = vcmp.ge.s32.totalorder %v3209_v17, %v3185_v12 }
 0x262   :  { %2538 = vmatmul.mubr.msk.bf16.gmra.mxu0 %vm654_vm6, %v3125_v35  ;;  %2543 = vmatmul.mubr.msk.bf16.gmra.mxu1 %vm654_vm6, %v3125_v35  ;;  %vm1121_vm2 = vcmp.ge.s32.totalorder %v3217_v21, %v3185_v12  ;;  %v3294_v39 = vadd.s32 384, %v3178_v10  ;;  %v3304_v41 = vadd.s32 256, %v3178_v10  ;;  %v3312_v43 = vmul.u32 32, %v3209_v17 }
 0x263   :  { %917 = vmatprep.mubr.bf16.mxu0 %v2944_v1  ;;  %1000 = vmatprep.mubr.bf16.mxu1 %v2944_v1  ;;  %vm1129_vm8 = vcmp.lt.s32.totalorder %v3190_v13, %v3193_v14  ;;  %vm1130_vm12 = vcmp.lt.s32.totalorder %v3206_v15, %v3193_v14  ;;  %vm1131_vm14 = vcmp.lt.s32.totalorder %v3209_v17, %v3193_v14  ;;  %v3321_v45 = vmul.u32 32, %v3206_v15 }
 0x264   :  { %2759 = vmatprep.subr.bf16.mxu0 %v4123_v0  ;;  %vm1139_vm9 = vmand %vm1118_vm7, %vm1129_vm8  ;;  %vm1132_vm3 = vcmp.lt.s32.totalorder %v3217_v21, %v3193_v14  ;;  %v3318_v44 = vadd.s32 32, %v3312_v43  ;;  %v1159_v46 = vadd.s32 128, %v3178_v10  ;;  %v3345_v48 = vmul.u32 32, %v3190_v13 }
 0x265   :  { %2760 = vmatpush3.bf16.msra.mxu0 %v2910_v25  ;;  %v1149_v18 = vsel %vm1139_vm9, 1.0, %v4123_v0  ;;  %vm1140_vm15 = vmand %vm1119_vm11, %vm1130_vm12  ;;  %vm1123_vm9 = vcmp.ge.s32.totalorder %v1110_v24, %v3185_v12  ;;  %vm1134_vm11 = vcmp.lt.s32.totalorder %v1110_v24, %v3193_v14  ;;  %vm1124_vm12 = vcmp.ge.s32.totalorder %v1111_v26, %v3185_v12 }
 0x266   :  { %2761 = vmatprep.subr.bf16.mxu0 %v4123_v0  ;;  %vm1141_vm1 = vmand %vm1120_vm13, %vm1131_vm14  ;;  %v1150_v27 = vsel %vm1140_vm15, 1.0, %v4123_v0  ;;  %vm1135_vm13 = vcmp.lt.s32.totalorder %v1111_v26, %v3193_v14  ;;  %v3342_v47 = vadd.s32 32, %v3321_v45  ;;  %v1163_v50 = vadd.s32 640, %v3178_v10 }
 0x267   :  { %v1151_v28 = vsel %vm1141_vm1, 1.0, %v4123_v0  ;;  %vm1142_vm7 = vmand %vm1121_vm2, %vm1132_vm3  ;;  %vm1125_vm1 = vcmp.ge.s32.totalorder %v1112_v29, %v3185_v12  ;;  %vm1136_vm2 = vcmp.lt.s32.totalorder %v1112_v29, %v3193_v14  ;;  %vm1126_vm3 = vcmp.ge.s32.totalorder %v1113_v30, %v3185_v12 }
 0x268   :  { %v1152_v31 = vsel %vm1142_vm7, 1.0, %v4123_v0  ;;  %vm1144_vm14 = vmand %vm1123_vm9, %vm1134_vm11  ;;  %v1165_v51 = vadd.s32 896, %v3178_v10  ;;  %v1162_v52 = vadd.s32 512, %v3178_v10  ;;  %v1164_v53 = vadd.s32 768, %v3178_v10 }
 0x269   :  { %2762 = vmatpush3.bf16.msra.mxu0 %v2911_v20  ;;  %vm1145_vm15 = vmand %vm1124_vm12, %vm1135_vm13  ;;  %v1154_v33 = vsel %vm1144_vm14, 1.0, %v4123_v0 }
 0x26a   :  { %2539 = vmatmul.mubr.msk.bf16.gmra.mxu0 %vm654_vm6, %v3133_v49  ;;  %2544 = vmatmul.mubr.msk.bf16.gmra.mxu1 %vm654_vm6, %v3133_v49  ;;  %v1155_v34 = vsel %vm1145_vm15, 1.0, %v4123_v0  ;;  %vm1189_vm15 = vcmp.ge.s32.totalorder %v3294_v39, %v3312_v43 }
 0x26b   :  { %927 = vmatprep.mubr.bf16.mxu0 %v2944_v1  ;;  %1010 = vmatprep.mubr.bf16.mxu1 %v2944_v1 }
 0x26c   :  { %2763 = vmatprep.subr.bf16.mxu0 %v4123_v0 }
 0x26d   :  { %2764 = vmatpush3.bf16.msra.mxu0 %v2912_v11 }
 0x272   :  { %2540 = vmatmul.mubr.msk.bf16.gmra.mxu0 %vm654_vm6, %v3142_v59  ;;  %2545 = vmatmul.mubr.msk.bf16.gmra.mxu1 %vm654_vm6, %v3142_v59 }
 0x273   :  { %937 = vmatprep.mubr.bf16.mxu0 %v2944_v1  ;;  %1020 = vmatprep.mubr.bf16.mxu1 %v2944_v1  ;;  %v1109_v1 = vadd.s32 32, %v3190_v13 }
 0x275   :  { %vm1122_vm4 = vcmp.ge.s32.totalorder %v1109_v1, %v3185_v12  ;;  %vm1133_vm5 = vcmp.lt.s32.totalorder %v1109_v1, %v3193_v14 }
 0x276   :  { %vm1143_vm8 = vmand %vm1122_vm4, %vm1133_vm5  ;;  %vm1137_vm4 = vcmp.lt.s32.totalorder %v1113_v30, %v3193_v14 }
 0x277   :  { %v1153_v32 = vsel %vm1143_vm8, 1.0, %v4123_v0  ;;  %vm1146_vm5 = vmand %vm1125_vm1, %vm1136_vm2  ;;  %vm1225_vm1 = vcmp.lt.s32.totalorder %v3294_v39, %v3318_v44  ;;  %vm1188_vm2 = vcmp.ge.s32.totalorder %v3304_v41, %v3312_v43 }
 0x278   :  { %vm1147_vm7 = vmand %vm1126_vm3, %vm1137_vm4  ;;  %v1156_v36 = vsel %vm1146_vm5, 1.0, %v4123_v0  ;;  %vm1224_vm3 = vcmp.lt.s32.totalorder %v3304_v41, %v3318_v44 }
 0x279   :  { %v1157_v37 = vsel %vm1147_vm7, 1.0, %v4123_v0  ;;  %vm1257_vm4 = vmand %vm1189_vm15, %vm1225_vm1  ;;  %vm1222_vm15 = vcmp.lt.s32.totalorder %v3178_v10, %v3318_v44 }
 0x27a   :  { %2541 = vmatmul.mubr.msk.bf16.gmra.mxu0 %vm654_vm6, %v3151_v4  ;;  %2546 = vmatmul.mubr.msk.bf16.gmra.mxu1 %vm654_vm6, %v3151_v4  ;;  %vm1256_vm5 = vmand %vm1188_vm2, %vm1224_vm3  ;;  %vm1179_vm2 = vcmp.ge.s32.totalorder %v1159_v46, %v3321_v45  ;;  %vm1215_vm3 = vcmp.lt.s32.totalorder %v1159_v46, %v3342_v47 }
 0x27b   :  { %2765 = vmatprep.mubr.msk.bf16.mxu0 %vm2943_vm0, %v4123_v0  ;;  %2789 = vmatprep.mubr.msk.f32.mxu1 %vm1302_vm10, %v1149_v18 }
 0x282   :  { %2766 = vmatmul.mubr.msk.bf16.vlgmr.msra.gmra.mxu0 %vm654_vm6, %v3116_v16  ;;  %2790 = vmatmul.mubr.msk.f32.vlgmr.msra.gmra.mxu1 %vm1302_vm10, %v1150_v27  ;;  %v1114_v16 = vadd.s32 72, %v3190_v13 }
 0x283   :  { %2792 = vmatprep.mubr.msk.f32.mxu1 %vm1302_vm10, %v1151_v28  ;;  %2769 = vmatprep.mubr.msk.bf16.mxu0 %vm2943_vm0, %v4123_v0 }
 0x284   :  { %vm1127_vm8 = vcmp.ge.s32.totalorder %v1114_v16, %v3185_v12  ;;  %vm1138_vm9 = vcmp.lt.s32.totalorder %v1114_v16, %v3193_v14 }
 0x285   :  { %vm1148_vm11 = vmand %vm1127_vm8, %vm1138_vm9 }
 0x286   :  { %2793 = vmatmul.mubr.msk.f32.gmra.mxu1 %vm1302_vm10, %v1152_v31  ;;  %v1158_v38 = vsel %vm1148_vm11, 1.0, %v4123_v0 }
 0x287   :  { %2795 = vmatprep.mubr.msk.f32.mxu1 %vm1302_vm10, %v1153_v32 }
 0x28a   :  { %2770 = vmatmul.mubr.msk.bf16.gmra.mxu0 %vm654_vm6, %v3125_v35  ;;  %2796 = vmatmul.mubr.msk.f32.gmra.mxu1 %vm1302_vm10, %v1154_v33  ;;  %v3291_v35 = vmul.u32 32, %v3217_v21 }
 0x28b   :  { %2773 = vmatprep.mubr.msk.bf16.mxu0 %vm2943_vm0, %v4123_v0  ;;  %2798 = vmatprep.mubr.msk.f32.mxu1 %vm1302_vm10, %v1155_v34 }
 0x28c   :  { %v3297_v40 = vadd.s32 32, %v3291_v35  ;;  %vm1196_vm12 = vcmp.ge.s32.totalorder %v3304_v41, %v3291_v35  ;;  %vm1195_vm7 = vcmp.ge.s32.totalorder %v1159_v46, %v3291_v35  ;;  %vm1194_vm11 = vcmp.ge.s32.totalorder %v3178_v10, %v3291_v35 }
 0x28e   :  { %2799 = vmatmul.mubr.msk.f32.gmra.mxu1 %vm1302_vm10, %v1156_v36  ;;  %vm1232_vm13 = vcmp.lt.s32.totalorder %v3304_v41, %v3297_v40  ;;  %vm1231_vm8 = vcmp.lt.s32.totalorder %v1159_v46, %v3297_v40 }
 0x28f   :  { %2801 = vmatprep.mubr.msk.f32.mxu1 %vm1302_vm10, %v1157_v37  ;;  %vm1264_vm14 = vmand %vm1196_vm12, %vm1232_vm13  ;;  %vm1223_vm12 = vcmp.lt.s32.totalorder %v1159_v46, %v3318_v44 }
 0x290   :  { %vm1263_vm9 = vmand %vm1195_vm7, %vm1231_vm8  ;;  %vm1178_vm8 = vcmp.ge.s32.totalorder %v3178_v10, %v3321_v45 }
 0x291   :  { %2562 = vmatprep.subr.msk.mxu1 %vm1263_vm9, %v4121_v42  ;;  %vm1247_vm7 = vmand %vm1179_vm2, %vm1215_vm3  ;;  %vm1214_vm9 = vcmp.lt.s32.totalorder %v3178_v10, %v3342_v47  ;;  %vm1170_vm2 = vcmp.ge.s32.totalorder %v3178_v10, %v3345_v48 }
 0x292   :  { %2774 = vmatmul.mubr.msk.bf16.gmra.mxu0 %vm654_vm6, %v3133_v49  ;;  %2802 = vmatmul.mubr.msk.f32.gmra.mxu1 %vm1302_vm10, %v1158_v38  ;;  %vm1197_vm10 = vcmp.ge.s32.totalorder %v3294_v39, %v3291_v35  ;;  %v3371_v49 = vadd.s32 32, %v3345_v48 }
 0x293   :  { %2777 = vmatprep.mubr.msk.bf16.mxu0 %vm2943_vm0, %v4123_v0  ;;  %1543 = vmatprep.mubr.f32.mxu1 %v4123_v0 }
 0x294   :  { %vm1206_vm3 = vcmp.lt.s32.totalorder %v3178_v10, %v3371_v49 }
 0x29a   :  { %2778 = vmatmul.mubr.msk.bf16.gmra.mxu0 %vm654_vm6, %v3142_v59  ;;  %v4149_v59 = vmov 0 }
 0x29b   :  { %2781 = vmatprep.mubr.msk.bf16.mxu0 %vm2943_vm0, %v4123_v0  ;;  %vm1233_vm0 = vcmp.lt.s32.totalorder %v3294_v39, %v3297_v40 }
 0x2a2   :  { %2782 = vmatmul.mubr.msk.bf16.gmra.mxu0 %vm654_vm6, %v3151_v4  ;;  %vm1265_vm6 = vmand %vm1197_vm10, %vm1233_vm0  ;;  %vm1230_vm10 = vcmp.lt.s32.totalorder %v3178_v10, %v3297_v40 }
 0x2a3   :  { %1668 = vmatprep.mubr.f32.mxu0 %v4123_v0  ;;  %2580 = vmatprep.subr.msk.mxu0 %vm1265_vm6, %v4121_v42  ;;  %vm1262_vm0 = vmand %vm1194_vm11, %vm1230_vm10  ;;  %vm1187_vm6 = vcmp.ge.s32.totalorder %v1159_v46, %v3312_v43  ;;  %vm1180_vm11 = vcmp.ge.s32.totalorder %v3304_v41, %v3321_v45  ;;  %vm1216_vm10 = vcmp.lt.s32.totalorder %v3304_v41, %v3342_v47 }
 0x2a4   :  { %2581 = vmatpush1.msk.msra.mxu0 %vm1264_vm14, %v4121_v42  ;;  %2563 = vmatpush1.msk.msra.mxu1 %vm1262_vm0, %v4121_v42  ;;  %vm1255_vm13 = vmand %vm1187_vm6, %vm1223_vm12  ;;  %vm1186_vm14 = vcmp.ge.s32.totalorder %v3178_v10, %v3312_v43  ;;  %vm1171_vm6 = vcmp.ge.s32.totalorder %v1159_v46, %v3345_v48 }
 0x2a5   :  { %2582 = vmatprep.subr.msk.mxu0 %vm1257_vm4, %v4121_v42  ;;  %2564 = vmatprep.subr.msk.mxu1 %vm1255_vm13, %v4121_v42  ;;  %vm1254_vm1 = vmand %vm1186_vm14, %vm1222_vm15  ;;  %vm1181_vm4 = vcmp.ge.s32.totalorder %v3294_v39, %v3321_v45  ;;  %vm1173_vm13 = vcmp.ge.s32.totalorder %v3294_v39, %v3345_v48  ;;  %vm1207_vm15 = vcmp.lt.s32.totalorder %v1159_v46, %v3371_v49 }
 0x2a6   :  { %2583 = vmatpush1.msk.msra.mxu0 %vm1256_vm5, %v4121_v42  ;;  %vm1217_vm5 = vcmp.lt.s32.totalorder %v3294_v39, %v3342_v47  ;;  %2565 = vmatpush1.msk.msra.mxu1 %vm1254_vm1, %v4121_v42  ;;  %vm1246_vm12 = vmand %vm1178_vm8, %vm1214_vm9  ;;  %vm1209_vm1 = vcmp.lt.s32.totalorder %v3294_v39, %v3371_v49 }
 0x2a7   :  { %2566 = vmatprep.subr.msk.mxu1 %vm1247_vm7, %v4121_v42  ;;  %vm1249_vm0 = vmand %vm1181_vm4, %vm1217_vm5  ;;  %vm1172_vm5 = vcmp.ge.s32.totalorder %v3304_v41, %v3345_v48  ;;  %vm1208_vm7 = vcmp.lt.s32.totalorder %v3304_v41, %v3371_v49 }
 0x2a8   :  { %2584 = vmatprep.subr.msk.mxu0 %vm1249_vm0, %v4121_v42  ;;  %2567 = vmatpush1.msk.msra.mxu1 %vm1246_vm12, %v4121_v42  ;;  %vm1248_vm14 = vmand %vm1180_vm11, %vm1216_vm10  ;;  %vm1199_vm10 = vcmp.ge.s32.totalorder %v1163_v50, %v3291_v35  ;;  %vm1235_vm0 = vcmp.lt.s32.totalorder %v1163_v50, %v3297_v40  ;;  %vm1237_vm12 = vcmp.lt.s32.totalorder %v1165_v51, %v3297_v40 }
 0x2a9   :  { %2585 = vmatpush1.msk.msra.mxu0 %vm1248_vm14, %v4121_v42  ;;  %vm1239_vm4 = vmand %vm1171_vm6, %vm1207_vm15  ;;  %vm1201_vm6 = vcmp.ge.s32.totalorder %v1165_v51, %v3291_v35  ;;  %vm1198_vm15 = vcmp.ge.s32.totalorder %v1162_v52, %v3291_v35 }
 0x2aa   :  { %2568 = vmatprep.subr.msk.mxu1 %vm1239_vm4, %v4121_v42  ;;  %vm1241_vm8 = vmand %vm1173_vm13, %vm1209_vm1  ;;  %vm1234_vm1 = vcmp.lt.s32.totalorder %v1162_v52, %v3297_v40 }
 0x2ab   :  { %2586 = vmatprep.subr.msk.mxu0 %vm1241_vm8, %v4121_v42  ;;  %vm1238_vm9 = vmand %vm1170_vm2, %vm1206_vm3  ;;  %vm1200_vm2 = vcmp.ge.s32.totalorder %v1164_v53, %v3291_v35  ;;  %vm1236_vm3 = vcmp.lt.s32.totalorder %v1164_v53, %v3297_v40  ;;  %vm1227_vm8 = vcmp.lt.s32.totalorder %v1163_v50, %v3318_v44 }
 0x2ac   :  { %2569 = vmatpush1.msk.msra.mxu1 %vm1238_vm9, %v4121_v42  ;;  %vm1240_vm11 = vmand %vm1172_vm5, %vm1208_vm7  ;;  %vm1191_vm7 = vcmp.ge.s32.totalorder %v1163_v50, %v3312_v43  ;;  %vm1193_vm9 = vcmp.ge.s32.totalorder %v1165_v51, %v3312_v43 }
 0x2ad   :  { %2587 = vmatpush1.msk.msra.mxu0 %vm1240_vm11, %v4121_v42  ;;  %vm1267_vm13 = vmand %vm1199_vm10, %vm1235_vm0  ;;  %vm1229_vm11 = vcmp.lt.s32.totalorder %v1165_v51, %v3318_v44  ;;  %vm1190_vm0 = vcmp.ge.s32.totalorder %v1162_v52, %v3312_v43 }
 0x2ae   :  { %2598 = vmatprep.subr.msk.mxu1 %vm1267_vm13, %v4121_v42  ;;  %vm1269_vm14 = vmand %vm1201_vm6, %vm1237_vm12  ;;  %vm1226_vm6 = vcmp.lt.s32.totalorder %v1162_v52, %v3318_v44  ;;  %vm1192_vm12 = vcmp.ge.s32.totalorder %v1164_v53, %v3312_v43  ;;  %vm1228_vm13 = vcmp.lt.s32.totalorder %v1164_v53, %v3318_v44 }
 0x2af   :  { %2616 = vmatprep.subr.msk.mxu0 %vm1269_vm14, %v4121_v42  ;;  %vm3407_vm4 = vmand %vm1198_vm15, %vm1234_vm1 }
 0x2b0   :  { %vm3411_vm5 = vmand %vm1200_vm2, %vm1236_vm3  ;;  %vm1183_vm2 = vcmp.ge.s32.totalorder %v1163_v50, %v3321_v45  ;;  %vm1219_vm3 = vcmp.lt.s32.totalorder %v1163_v50, %v3342_v47 }
 0x2b1   :  { %v4142_v55 = vsel %vm3411_vm5, 4294967295, %v4141_v55  ;;  %vm3419_vm10 = vmand %vm1191_vm7, %vm1227_vm8  ;;  %vm1185_vm7 = vcmp.ge.s32.totalorder %v1165_v51, %v3321_v45  ;;  %vm1221_vm8 = vcmp.lt.s32.totalorder %v1165_v51, %v3342_v47  ;;  %vm1212_vm5 = vcmp.lt.s32.totalorder %v1164_v53, %v3371_v49 }
 0x2b2   :  { %v4144_v56 = vsel %vm3419_vm10, 4294967295, %v4143_v56  ;;  %vm3427_vm14 = vmand %vm1193_vm9, %vm1229_vm11  ;;  %vm1182_vm11 = vcmp.ge.s32.totalorder %v1162_v52, %v3321_v45  ;;  %vm1176_vm10 = vcmp.ge.s32.totalorder %v1164_v53, %v3345_v48 }
 0x2b3   :  { %v4146_v57 = vsel %vm3427_vm14, 4294967295, %v4145_v57  ;;  %vm3431_vm15 = vmand %vm1190_vm0, %vm1226_vm6  ;;  %vm1218_vm0 = vcmp.lt.s32.totalorder %v1162_v52, %v3342_v47  ;;  %vm1184_vm6 = vcmp.ge.s32.totalorder %v1164_v53, %v3321_v45 }
 0x2b4   :  { %v4148_v58 = vsel %vm3431_vm15, 4294967295, %v4147_v58  ;;  %vm3435_vm1 = vmand %vm1192_vm12, %vm1228_vm13  ;;  %vm1220_vm12 = vcmp.lt.s32.totalorder %v1164_v53, %v3342_v47  ;;  %vm1211_vm15 = vcmp.lt.s32.totalorder %v1163_v50, %v3371_v49 }
 0x2b5   :  { %v4150_v59 = vsel %vm3435_vm1, 4294967295, %v4149_v59  ;;  %vm3443_vm9 = vmand %vm1183_vm2, %vm1219_vm3  ;;  %vm1175_vm1 = vcmp.ge.s32.totalorder %v1163_v50, %v3345_v48  ;;  %vm1177_vm2 = vcmp.ge.s32.totalorder %v1165_v51, %v3345_v48  ;;  %vm1213_vm3 = vcmp.lt.s32.totalorder %v1165_v51, %v3371_v49 }
 0x2b6   :  { %v4152_v60 = vsel %vm3443_vm9, 4294967295, %v4151_v60  ;;  %vm3451_vm13 = vmand %vm1185_vm7, %vm1221_vm8  ;;  %vm1174_vm7 = vcmp.ge.s32.totalorder %v1162_v52, %v3345_v48  ;;  %vm1210_vm8 = vcmp.lt.s32.totalorder %v1162_v52, %v3371_v49 }
 0x2b7   :  { %v4154_v61 = vsel %vm3451_vm13, 4294967295, %v4153_v61  ;;  %vm3459_vm9 = vmand %vm1182_vm11, %vm1218_vm0 }
 0x2b8   :  { %vm3463_vm14 = vmand %vm1184_vm6, %vm1220_vm12  ;;  %vm4213_vm12 = vnez %v4150_v59 }
 0x2b9   :  { %vm3469_vm13 = vmand %vm1175_vm1, %vm1211_vm15  ;;  %vm4209_vm15 = vnez %v4144_v56  ;;  %vm4210_vm1 = vnez %v4146_v57 }
 0x2ba   :  { %vm3475_vm11 = vmand %vm1177_vm2, %vm1213_vm3  ;;  %vm4214_vm2 = vnez %v4152_v60  ;;  %vm4215_vm3 = vnez %v4154_v61 }
 0x2bb   :  { %vm3479_vm0 = vmand %vm1174_vm7, %vm1210_vm8  ;;  %vm2339_vm7 = vcmask 654336  }
 0x2bc   :  { %vm3483_vm6 = vmand %vm1176_vm10, %vm1212_vm5  ;;  %vm1448_vm5 = vcmask 261120   ;;  %vm4208_vm10 = vnez %v4142_v55 }
 0x2f2   :  { %v3487_v8 = vpop.f32.mrf.mxu0  ;;  %v3489_v9 = vpop.f32.mrf.mxu1 }
 0x2f4   :  { %v3491_v25 = vpop.f32.mrf.mxu0  ;;  %v3493_v23 = vpop.f32.mrf.mxu1 }
 0x2f6   :  { %v3495_v20 = vpop.f32.mrf.mxu0  ;;  %v3497_v11 = vpop.f32.mrf.mxu1 }
 0x2f8   :  { %v3499_v12 = vpop.f32.mrf.mxu0  ;;  %v3501_v14 = vpop.f32.mrf.mxu1 }
 0x2fa   :  { %v3503_v17 = vpop.f32.mrf.mxu0  ;;  %v3505_v18 = vpop.f32.mrf.mxu1 }
 0x2fc   :  { %v3507_v21 = vpop.f32.mrf.mxu0  ;;  %v3509_v1 = vpop.f32.mrf.mxu1 }
 0x2fe   :  { %v3511_v24 = vpop.f32.mrf.mxu0  ;;  %v3513_v26 = vpop.f32.mrf.mxu1 }
 0x300   :  { %v3515_v27 = vpop.f32.mrf.mxu0  ;;  %v3517_v28 = vpop.f32.mrf.mxu1 }
 0x302   :  { %v3519_v29 = vpop.f32.mrf.mxu0  ;;  %v3521_v30 = vpop.f32.mrf.mxu1 }
 0x304   :  { %v3523_v31 = vpop.f32.mrf.mxu0  ;;  %v3525_v32 = vpop.f32.mrf.mxu1 }
 0x306   :  { %v3527_v16 = vpop.f32.mrf.mxu0  ;;  %v3529_v33 = vpop.f32.mrf.mxu1 }
 0x308   :  { %v3531_v34 = vpop.f32.mrf.mxu0  ;;  %v3533_v36 = vpop.f32.mrf.mxu1 }
 0x30a   :  { %v3535_v37 = vpop.f32.mrf.mxu0  ;;  %v3537_v38 = vpop.f32.mrf.mxu1 }
 0x30b   :  { %4167 = vst [vmem:[#allocation12_spill] sm:$0xff] %v3535_v37  ;;  %4168 = vst [vmem:[#allocation13_spill] sm:$0xff] %v3537_v38 }
 0x30c   :  { %v3539_v35 = vpop.f32.mrf.mxu0  ;;  %v3541_v39 = vpop.f32.mrf.mxu1 }
 0x30e   :  { %v3543_v40 = vpop.f32.mrf.mxu0  ;;  %v3545_v41 = vpop.f32.mrf.mxu1 }
 0x310   :  { %v3547_v43 = vpop.f32.mrf.mxu0  ;;  %v3549_v44 = vpop.f32.mrf.mxu1 }
 0x312   :  { %v3551_v45 = vpop.f32.mrf.mxu0  ;;  %v3553_v46 = vpop.f32.mrf.mxu1 }
 0x314   :  { %v3555_v47 = vpop.f32.mrf.mxu0  ;;  %v3557_v48 = vpop.f32.mrf.mxu1 }
 0x316   :  { %v3559_v49 = vpop.f32.mrf.mxu0  ;;  %v3561_v50 = vpop.f32.mrf.mxu1 }
 0x317   :  { %4169 = vst [vmem:[#allocation14_spill] sm:$0xff] %v3559_v49  ;;  %4170 = vst [vmem:[#allocation15_spill] sm:$0xff] %v3561_v50 }
 0x318   :  { %v3563_v51 = vpop.f32.mrf.mxu0  ;;  %v3565_v52 = vpop.f32.mrf.mxu1 }
 0x319   :  { %4171 = vst [vmem:[#allocation16_spill] sm:$0xff] %v3563_v51  ;;  %4172 = vst [vmem:[#allocation17_spill] sm:$0xff] %v3565_v52 }
 0x31a   :  { %v3567_v53 = vpop.f32.mrf.mxu0  ;;  %v3569_v42 = vpop.f32.mrf.mxu1 }
 0x31b   :  { %4173 = vst [vmem:[#allocation18_spill] sm:$0xff] %v3567_v53  ;;  %4174 = vst [vmem:[#allocation19_spill] sm:$0xff] %v3569_v42 }
 0x31c   :  { %v3571_v0 = vpop.f32.mrf.mxu0  ;;  %v3573_v6 = vpop.f32.mrf.mxu1 }
 0x31d   :  { %4175 = vst [vmem:[#allocation20_spill] sm:$0xff] %v3571_v0  ;;  %4176 = vst [vmem:[#allocation21_spill] sm:$0xff] %v3573_v6 }
 0x31e   :  { %v3575_v5 = vpop.f32.mrf.mxu0  ;;  %v3577_v15 = vpop.f32.mrf.mxu1 }
 0x31f   :  { %4177 = vst [vmem:[#allocation22_spill] sm:$0xff] %v3575_v5  ;;  %4178 = vst [vmem:[#allocation23_spill] sm:$0xff] %v3577_v15 }
 0x320   :  { %v3579_v19 = vpop.f32.mrf.mxu0  ;;  %v3581_v10 = vpop.f32.mrf.mxu1 }
 0x321   :  { %4179 = vst [vmem:[#allocation24_spill] sm:$0xff] %v3579_v19  ;;  %4180 = vst [vmem:[#allocation25_spill] sm:$0xff] %v3581_v10 }
 0x322   :  { %v3583_v13 = vpop.f32.mrf.mxu0  ;;  %v3585_v22 = vpop.f32.mrf.mxu1 }
 0x323   :  { %4181 = vst [vmem:[#allocation26_spill] sm:$0xff] %v3583_v13  ;;  %4182 = vst [vmem:[#allocation27_spill] sm:$0xff] %v3585_v22 }
 0x324   :  { %v3587_v38 = vpop.f32.mrf.mxu0  ;;  %v3589_v53 = vpop.f32.mrf.mxu1 }
 0x325   :  { %4183 = vst [vmem:[#allocation28_spill] sm:$0xff] %v3587_v38  ;;  %4184 = vst [vmem:[#allocation29_spill] sm:$0xff] %v3589_v53 }
 0x326   :  { %v3591_v42 = vpop.f32.mrf.mxu0  ;;  %v3593_v0 = vpop.f32.mrf.mxu1 }
 0x327   :  { %4185 = vst [vmem:[#allocation30_spill] sm:$0xff] %v3591_v42  ;;  %4186 = vst [vmem:[#allocation31_spill] sm:$0xff] %v3593_v0 }
 0x328   :  { %v3595_v6 = vpop.f32.mrf.mxu0  ;;  %v3597_v37 = vpop.f32.mrf.mxu1 }
 0x329   :  { %4187 = vst [vmem:[#allocation32_spill] sm:$0xff] %v3595_v6  ;;  %4188 = vst [vmem:[#allocation33_spill] sm:$0xff] %v3597_v37 }
 0x32a   :  { %v3599_v15 = vpop.f32.mrf.mxu0  ;;  %v3601_v5 = vpop.f32.mrf.mxu1 }
 0x32b   :  { %4189 = vst [vmem:[#allocation34_spill] sm:$0xff] %v3599_v15  ;;  %4190 = vst [vmem:[#allocation35_spill] sm:$0xff] %v3601_v5 }
 0x32c   :  { %v3603_v10 = vpop.f32.mrf.mxu0  ;;  %v3605_v13 = vpop.f32.mrf.mxu1 }
 0x32d   :  { %4191 = vst [vmem:[#allocation36_spill] sm:$0xff] %v3603_v10  ;;  %4192 = vst [vmem:[#allocation37_spill] sm:$0xff] %v3605_v13 }
 0x32e   :  { %v3607_v22 = vpop.f32.mrf.mxu0  ;;  %v3609_v38 = vpop.f32.mrf.mxu1 }
 0x32f   :  { %4193 = vst [vmem:[#allocation38_spill] sm:$0xff] %v3607_v22  ;;  %4194 = vst [vmem:[#allocation39_spill] sm:$0xff] %v3609_v38 }
 0x330   :  { %v3611_v53 = vpop.f32.mrf.mxu0  ;;  %v3613_v19 = vpop.f32.mrf.mxu1 }
 0x332   :  { %v3615_v0 = vpop.f32.mrf.mxu0  ;;  %v3617_v42 = vpop.f32.mrf.mxu1 }
 0x333   :  { %4195 = vst [vmem:[#allocation40_spill] sm:$0xff] %v3615_v0  ;;  %4196 = vst [vmem:[#allocation41_spill] sm:$0xff] %v3617_v42 }
 0x334   :  { %v3619_v50 = vpop.f32.mrf.mxu0  ;;  %v3621_v15 = vpop.f32.mrf.mxu1 }
 0x335   :  { %4197 = vst [vmem:[#allocation42_spill] sm:$0xff] %v3619_v50  ;;  %4198 = vst [vmem:[#allocation43_spill] sm:$0xff] %v3621_v15 }
 0x336   :  { %v3623_v5 = vpop.f32.mrf.mxu0  ;;  %v3625_v10 = vpop.f32.mrf.mxu1 }
 0x338   :  { %v3627_v13 = vpop.f32.mrf.mxu0  ;;  %v3629_v49 = vpop.f32.mrf.mxu1 }
 0x339   :  { %4199 = vst [vmem:[#allocation44_spill] sm:$0xff] %v3629_v49 }
 0x33a   :  { %v3631_v37 = vpop.f32.mrf.mxu0  ;;  %v3633_v6 = vpop.f32.mrf.mxu1 }
 0x33b   :  { %4200 = vst [vmem:[#allocation45_spill] sm:$0xff] %v3631_v37 }
 0x33c   :  { %v3635_v38 = vpop.f32.mrf.mxu0  ;;  %v3637_v0 = vpop.f32.mrf.mxu1 }
 0x33e   :  { %v3639_v42 = vpop.f32.mrf.mxu0  ;;  %v3641_v50 = vpop.f32.mrf.mxu1 }
 0x33f   :  { %4201 = vst [vmem:[#allocation46_spill] sm:$0xff] %v3639_v42  ;;  %4202 = vst [vmem:[#allocation47_spill] sm:$0xff] %v3641_v50  ;;  %v4206_v50 = vmov 0.0  }
 0x340   :  { %v3643_v15 = vpop.f32.mrf.mxu0  ;;  %v3645_v22 = vpop.f32.mrf.mxu1 }
 0x341   :  { %4203 = vst [vmem:[#allocation48_spill] sm:$0xff] %v3645_v22  ;;  %v4207_v22 = vmov 1.0  }
 0x342   :  { %v3647_v52 = vpop.f32.mrf.mxu0  ;;  %v3649_v51 = vpop.f32.mrf.mxu1 }
 0x343   :  { %4204 = vst [vmem:[#allocation49_spill] sm:$0xff] %v3647_v52 }
 0x344   :  { %v2767_v37 = vpop.f32.mrf.mxu0  ;;  %v3651_v49 = vpop.f32.mrf.mxu1 }
 0x345   :  { %2570 = vmatmul.mubr.msk.f32.vlgmr.msra.gmra.mxu1 %vm1448_vm5, %v3651_v49  ;;  %2588 = vmatmul.mubr.msk.f32.vlgmr.msra.gmra.mxu0 %vm1448_vm5, %v3651_v49 }
 0x346   :  { %v3657_v42 = vpop.f32.mrf.mxu0  ;;  %1549 = vmatprep.mubr.f32.mxu1 %v4206_v50  ;;  %1674 = vmatprep.mubr.f32.mxu0 %v4206_v50  ;;  %v3667_v52 = vpop.f32.mrf.mxu1 }
 0x347   :  { %4205 = vst [vmem:[#allocation50_spill] sm:$0xff] %v3657_v42  ;;  %2599 = vmatpush1.msk.msra.mxu1 %vm3407_vm4, %v4207_v22  ;;  %2617 = vmatpush1.msk.msra.mxu0 %vm4208_vm10, %v4207_v22  ;;  %vm4212_vm4 = vnez %v4148_v58 }
 0x348   :  { %v2768_v37 = vpop.f32.mrf.mxu0  ;;  %2600 = vmatprep.subr.msk.mxu1 %vm4209_vm15, %v4207_v22  ;;  %2618 = vmatprep.subr.msk.mxu0 %vm4210_vm1, %v4207_v22  ;;  %v3689_v55 = vpop.f32.mrf.mxu1  ;;  %vm2451_vm15 = vcmask 7168  }
 0x349   :  { %2571 = vmatmul.mubr.msk.f32.gmra.mxu1 %vm1448_vm5, %v3649_v51  ;;  %2589 = vmatmul.mubr.msk.f32.gmra.mxu0 %vm1448_vm5, %v3649_v51 }
 0x34a   :  { %v3679_v54 = vpop.f32.mrf.mxu0  ;;  %1555 = vmatprep.mubr.f32.mxu1 %v4206_v50  ;;  %1680 = vmatprep.mubr.f32.mxu0 %v4206_v50  ;;  %v3711_v59 = vpop.f32.mrf.mxu1 }
 0x34b   :  { %4211 = vst [vmem:[#allocation51_spill] sm:$0xff] %v3679_v54  ;;  %2601 = vmatpush1.msk.msra.mxu1 %vm4212_vm4, %v4207_v22  ;;  %2619 = vmatpush1.msk.msra.mxu0 %vm4213_vm12, %v4207_v22 }
 0x34c   :  { %v2771_v56 = vpop.f32.mrf.mxu0  ;;  %2602 = vmatprep.subr.msk.mxu1 %vm4214_vm2, %v4207_v22  ;;  %2620 = vmatprep.subr.msk.mxu0 %vm4215_vm3, %v4207_v22  ;;  %v1419_v61 = vpop.f32.mrf.mxu1 }
 0x34d   :  { %2572 = vmatmul.mubr.msk.f32.gmra.mxu1 %vm1448_vm5, %v3689_v55  ;;  %2590 = vmatmul.mubr.msk.f32.gmra.mxu0 %vm1448_vm5, %v3689_v55 }
 0x34e   :  { %v3701_v57 = vpop.f32.mrf.mxu0  ;;  %1561 = vmatprep.mubr.f32.mxu1 %v4206_v50  ;;  %1686 = vmatprep.mubr.f32.mxu0 %v4206_v50  ;;  %v2800_v3 = vpop.f32.mrf.mxu1 }
 0x34f   :  { %4216 = vst [vmem:[#allocation52_spill] sm:$0xff] %v3701_v57  ;;  %2603 = vmatpush1.msk.msra.mxu1 %vm3459_vm9, %v4207_v22  ;;  %2621 = vmatpush1.msk.msra.mxu0 %vm3463_vm14, %v4207_v22 }
 0x350   :  { %v2772_v58 = vpop.f32.mrf.mxu0  ;;  %2604 = vmatprep.subr.msk.mxu1 %vm3469_vm13, %v4207_v22  ;;  %2622 = vmatprep.subr.msk.mxu0 %vm3475_vm11, %v4207_v22  ;;  %v1429_v4 = vpop.f32.mrf.mxu1 }
 0x351   :  { %2573 = vmatmul.mubr.msk.f32.gmra.mxu1 %vm1448_vm5, %v3667_v52  ;;  %2591 = vmatmul.mubr.msk.f32.gmra.mxu0 %vm1448_vm5, %v3667_v52 }
 0x352   :  { %v3723_v60 = vpop.f32.mrf.mxu0  ;;  %1567 = vmatprep.mubr.f32.mxu1 %v4206_v50  ;;  %1692 = vmatprep.mubr.f32.mxu0 %v4206_v50  ;;  %v2803_v58 = vpop.f32.mrf.mxu1 }
 0x353   :  { %4217 = vst [vmem:[#allocation53_spill] sm:$0xff] %v3723_v60  ;;  %2605 = vmatpush1.msk.msra.mxu1 %vm3479_vm0, %v4207_v22  ;;  %2623 = vmatpush1.msk.msra.mxu0 %vm3483_vm6, %v4207_v22 }
 0x354   :  { %v2775_v62 = vpop.f32.mrf.mxu0 }
 0x355   :  { %2574 = vmatmul.mubr.msk.f32.gmra.mxu1 %vm1448_vm5, %v1419_v61  ;;  %2592 = vmatmul.mubr.msk.f32.gmra.mxu0 %vm1448_vm5, %v1419_v61 }
 0x356   :  { %v3735_v63 = vpop.f32.mrf.mxu0  ;;  %1573 = vmatprep.mubr.f32.mxu1 %v4206_v50  ;;  %1698 = vmatprep.mubr.f32.mxu0 %v4206_v50 }
 0x357   :  { %4218 = vst [vmem:[#allocation54_spill] sm:$0xff] %v3735_v63 }
 0x358   :  { %v2776_v2 = vpop.f32.mrf.mxu0 }
 0x359   :  { %2575 = vmatmul.mubr.msk.f32.gmra.mxu1 %vm1448_vm5, %v3711_v59  ;;  %2593 = vmatmul.mubr.msk.f32.gmra.mxu0 %vm1448_vm5, %v3711_v59  ;;  %v1439_v2 = vpop.f32.mrf.mxu1 }
 0x35a   :  { %v3743_v22 = vpop.f32.mrf.mxu0  ;;  %1579 = vmatprep.mubr.f32.mxu1 %v4206_v50  ;;  %1704 = vmatprep.mubr.f32.mxu0 %v4206_v50 }
 0x35b   :  { %4219 = vst [vmem:[#allocation55_spill] sm:$0xff] %v3743_v22 }
 0x35c   :  { %v2779_v7 = vpop.f32.mrf.mxu0 }
 0x35d   :  { %2576 = vmatmul.mubr.msk.f32.gmra.mxu1 %vm1448_vm5, %v1429_v4  ;;  %2594 = vmatmul.mubr.msk.f32.gmra.mxu0 %vm1448_vm5, %v1429_v4 }
 0x35e   :  { %v3749_v37 = vpop.f32.mrf.mxu0  ;;  %1585 = vmatprep.mubr.f32.mxu1 %v4206_v50  ;;  %1710 = vmatprep.mubr.f32.mxu0 %v4206_v50 }
 0x35f   :  { %4220 = vst [vmem:[#allocation56_spill] sm:$0xff] %v3749_v37 }
 0x360   :  { %v2780_v56 = vpop.f32.mrf.mxu0 }
 0x361   :  { %2577 = vmatmul.mubr.msk.f32.gmra.mxu1 %vm1448_vm5, %v2800_v3  ;;  %2595 = vmatmul.mubr.msk.f32.gmra.mxu0 %vm1448_vm5, %v2800_v3 }
 0x362   :  { %v3755_v62 = vpop.f32.mrf.mxu0  ;;  %1591 = vmatprep.mubr.f32.mxu1 %v4206_v50  ;;  %1716 = vmatprep.mubr.f32.mxu0 %v4206_v50 }
 0x363   :  { %4221 = vst [vmem:[#allocation57_spill] sm:$0xff] %v3755_v62 }
 0x364   :  { %v2783_v7 = vpop.f32.mrf.mxu0 }
 0x365   :  { %2578 = vmatmul.mubr.msk.f32.gmra.mxu1 %vm1448_vm5, %v1439_v2  ;;  %2596 = vmatmul.mubr.msk.f32.gmra.mxu0 %vm1448_vm5, %v1439_v2 }
 0x366   :  { %v3761_v42 = vpop.f32.mrf.mxu0  ;;  %1597 = vmatprep.mubr.f32.mxu1 %v4206_v50  ;;  %1722 = vmatprep.mubr.f32.mxu0 %v4206_v50 }
 0x367   :  { %4222 = vst [vmem:[#allocation58_spill] sm:$0xff] %v3761_v42 }
 0x368   :  { %v2784_v56 = vpop.f32.mrf.mxu0 }
 0x369   :  { %2579 = vmatmul.mubr.msk.f32.gmra.mxu1 %vm1448_vm5, %v2803_v58  ;;  %2597 = vmatmul.mubr.msk.f32.gmra.mxu0 %vm1448_vm5, %v2803_v58 }
 0x36a   :  { %1793 = vmatprep.mubr.f32.mxu1 %v4206_v50  ;;  %1918 = vmatprep.mubr.f32.mxu0 %v4206_v50 }
 0x36d   :  { %2606 = vmatmul.mubr.msk.f32.vlgmr.msra.gmra.mxu1 %vm1448_vm5, %v3651_v49  ;;  %2624 = vmatmul.mubr.msk.f32.vlgmr.msra.gmra.mxu0 %vm1448_vm5, %v3651_v49 }
 0x36e   :  { %1799 = vmatprep.mubr.f32.mxu1 %v4206_v50  ;;  %1924 = vmatprep.mubr.f32.mxu0 %v4206_v50 }
 0x371   :  { %2607 = vmatmul.mubr.msk.f32.gmra.mxu1 %vm1448_vm5, %v3649_v51  ;;  %2625 = vmatmul.mubr.msk.f32.gmra.mxu0 %vm1448_vm5, %v3649_v51 }
 0x372   :  { %1805 = vmatprep.mubr.f32.mxu1 %v4206_v50  ;;  %1930 = vmatprep.mubr.f32.mxu0 %v4206_v50 }
 0x375   :  { %2608 = vmatmul.mubr.msk.f32.gmra.mxu1 %vm1448_vm5, %v3689_v55  ;;  %2626 = vmatmul.mubr.msk.f32.gmra.mxu0 %vm1448_vm5, %v3689_v55 }
 0x376   :  { %1811 = vmatprep.mubr.f32.mxu1 %v4206_v50  ;;  %1936 = vmatprep.mubr.f32.mxu0 %v4206_v50 }
 0x379   :  { %2609 = vmatmul.mubr.msk.f32.gmra.mxu1 %vm1448_vm5, %v3667_v52  ;;  %2627 = vmatmul.mubr.msk.f32.gmra.mxu0 %vm1448_vm5, %v3667_v52 }
 0x37a   :  { %1817 = vmatprep.mubr.f32.mxu1 %v4206_v50  ;;  %1942 = vmatprep.mubr.f32.mxu0 %v4206_v50 }
 0x37d   :  { %2610 = vmatmul.mubr.msk.f32.gmra.mxu1 %vm1448_vm5, %v1419_v61  ;;  %2628 = vmatmul.mubr.msk.f32.gmra.mxu0 %vm1448_vm5, %v1419_v61 }
 0x37e   :  { %1823 = vmatprep.mubr.f32.mxu1 %v4206_v50  ;;  %1948 = vmatprep.mubr.f32.mxu0 %v4206_v50 }
 0x381   :  { %2611 = vmatmul.mubr.msk.f32.gmra.mxu1 %vm1448_vm5, %v3711_v59  ;;  %2629 = vmatmul.mubr.msk.f32.gmra.mxu0 %vm1448_vm5, %v3711_v59 }
 0x382   :  { %1829 = vmatprep.mubr.f32.mxu1 %v4206_v50  ;;  %1954 = vmatprep.mubr.f32.mxu0 %v4206_v50 }
 0x385   :  { %2612 = vmatmul.mubr.msk.f32.gmra.mxu1 %vm1448_vm5, %v1429_v4  ;;  %2630 = vmatmul.mubr.msk.f32.gmra.mxu0 %vm1448_vm5, %v1429_v4 }
 0x386   :  { %1835 = vmatprep.mubr.f32.mxu1 %v4206_v50  ;;  %1960 = vmatprep.mubr.f32.mxu0 %v4206_v50 }
 0x389   :  { %2613 = vmatmul.mubr.msk.f32.gmra.mxu1 %vm1448_vm5, %v2800_v3  ;;  %2631 = vmatmul.mubr.msk.f32.gmra.mxu0 %vm1448_vm5, %v2800_v3 }
 0x38a   :  { %1841 = vmatprep.mubr.f32.mxu1 %v4206_v50  ;;  %1966 = vmatprep.mubr.f32.mxu0 %v4206_v50 }
 0x38d   :  { %2614 = vmatmul.mubr.msk.f32.gmra.mxu1 %vm1448_vm5, %v1439_v2  ;;  %2632 = vmatmul.mubr.msk.f32.gmra.mxu0 %vm1448_vm5, %v1439_v2 }
 0x38e   :  { %1847 = vmatprep.mubr.f32.mxu1 %v4206_v50  ;;  %1972 = vmatprep.mubr.f32.mxu0 %v4206_v50 }
 0x391   :  { %2615 = vmatmul.mubr.msk.f32.gmra.mxu1 %vm1448_vm5, %v2803_v58  ;;  %2633 = vmatmul.mubr.msk.f32.gmra.mxu0 %vm1448_vm5, %v2803_v58 }
 0x405   :  { %v1545_v49 = vpop.f32.mrf.mxu1  ;;  %v1670_v51 = vpop.f32.mrf.mxu0 }
 0x406   :  { %v1979_v59 = vmul.f32 %v1545_v49, %v3487_v8  ;;  %v1981_v61 = vmul.f32 %v1670_v51, %v3489_v9 }
 0x407   :  { %v1547_v52 = vpop.f32.mrf.mxu1  ;;  %v1672_v55 = vpop.f32.mrf.mxu0 }
 0x408   :  { %v1980_v3 = vmul.f32 %v1547_v52, %v3491_v25  ;;  %v1982_v4 = vmul.f32 %v1672_v55, %v3493_v23 }
 0x409   :  { %v1551_v2 = vpop.f32.mrf.mxu1  ;;  %v1676_v7 = vpop.f32.mrf.mxu0 }
 0x40a   :  { %v2059_v56 = vadd.f32 %v1980_v3, %v1979_v59  ;;  %v2069_v54 = vadd.f32 %v1982_v4, %v1981_v61  ;;  %v1987_v57 = vmul.f32 %v1551_v2, %v3495_v20  ;;  %v1989_v22 = vmul.f32 %v1676_v7, %v3497_v11 }
 0x40b   :  { %v1553_v60 = vpop.f32.mrf.mxu1  ;;  %v1678_v58 = vpop.f32.mrf.mxu0 }
 0x40c   :  { %v3822_v63 = vadd.f32 %v2069_v54, %v2059_v56  ;;  %v1988_v8 = vmul.f32 %v1553_v60, %v3499_v12  ;;  %v1990_v9 = vmul.f32 %v1678_v58, %v3501_v14 }
 0x40d   :  { %v1557_v49 = vpop.f32.mrf.mxu1  ;;  %v1682_v25 = vpop.f32.mrf.mxu0 }
 0x40e   :  { %4223 = vst [vmem:[#allocation59_spill] sm:$0xff] %v3822_v63  ;;  %v2060_v51 = vadd.f32 %v1988_v8, %v1987_v57  ;;  %v2070_v23 = vadd.f32 %v1990_v9, %v1989_v22  ;;  %v1995_v52 = vmul.f32 %v1557_v49, %v3503_v17  ;;  %v1997_v20 = vmul.f32 %v1682_v25, %v3505_v18 }
 0x40f   :  { %v1559_v55 = vpop.f32.mrf.mxu1  ;;  %v1684_v59 = vpop.f32.mrf.mxu0 }
 0x410   :  { %v3828_v61 = vadd.f32 %v2070_v23, %v2060_v51  ;;  %v1996_v54 = vmul.f32 %v1559_v55, %v3507_v21  ;;  %v1998_v11 = vmul.f32 %v1684_v59, %v3509_v1 }
 0x411   :  { %v1563_v3 = vpop.f32.mrf.mxu1  ;;  %v1688_v12 = vpop.f32.mrf.mxu0 }
 0x412   :  { %4224 = vst [vmem:[#allocation60_spill] sm:$0xff] %v3828_v61  ;;  %v2061_v60 = vadd.f32 %v1996_v54, %v1995_v52  ;;  %v2071_v14 = vadd.f32 %v1998_v11, %v1997_v20  ;;  %v2003_v4 = vmul.f32 %v1563_v3, %v3511_v24  ;;  %v2005_v17 = vmul.f32 %v1688_v12, %v3513_v26 }
 0x413   :  { %v1565_v57 = vpop.f32.mrf.mxu1  ;;  %v1690_v22 = vpop.f32.mrf.mxu0 }
 0x414   :  { %v3834_v2 = vadd.f32 %v2071_v14, %v2061_v60  ;;  %v2004_v7 = vmul.f32 %v1565_v57, %v3515_v27  ;;  %v2006_v18 = vmul.f32 %v1690_v22, %v3517_v28 }
 0x415   :  { %v1569_v56 = vpop.f32.mrf.mxu1  ;;  %v1694_v21 = vpop.f32.mrf.mxu0 }
 0x416   :  { %4225 = vst [vmem:[#allocation61_spill] sm:$0xff] %v3834_v2  ;;  %v2062_v58 = vadd.f32 %v2004_v7, %v2003_v4  ;;  %v2072_v1 = vadd.f32 %v2006_v18, %v2005_v17  ;;  %v2011_v8 = vmul.f32 %v1569_v56, %v3519_v29  ;;  %v2013_v24 = vmul.f32 %v1694_v21, %v3521_v30 }
 0x417   :  { %v1571_v9 = vpop.f32.mrf.mxu1  ;;  %v1696_v49 = vpop.f32.mrf.mxu0 }
 0x418   :  { %v3840_v25 = vadd.f32 %v2072_v1, %v2062_v58  ;;  %v2012_v51 = vmul.f32 %v1571_v9, %v3523_v31  ;;  %v2014_v26 = vmul.f32 %v1696_v49, %v3525_v32 }
 0x419   :  { %v1575_v23 = vpop.f32.mrf.mxu1  ;;  %v1700_v27 = vpop.f32.mrf.mxu0 }
 0x41a   :  { %4226 = vst [vmem:[#allocation62_spill] sm:$0xff] %v3840_v25  ;;  %v2063_v52 = vadd.f32 %v2012_v51, %v2011_v8  ;;  %v2073_v28 = vadd.f32 %v2014_v26, %v2013_v24 }
 0x41b   :  { %v1577_v55 = vpop.f32.mrf.mxu1  ;;  %v1702_v59 = vpop.f32.mrf.mxu0 }
 0x41c   :  { %v3845_v20 = vadd.f32 %v2073_v28, %v2063_v52 }
 0x41d   :  { %v3847_v54 = vpop.f32.mrf.mxu1  ;;  %v3849_v29 = vpop.f32.mrf.mxu0 }
 0x41e   :  { %4227 = vst [vmem:[#allocation63_spill] sm:$0xff] %v3845_v20 }
 0x41f   :  { %v1583_v11 = vpop.f32.mrf.mxu1  ;;  %v1708_v3 = vpop.f32.mrf.mxu0 }
 0x421   :  { %v1587_v12 = vpop.f32.mrf.mxu1  ;;  %v1712_v30 = vpop.f32.mrf.mxu0 }
 0x422   :  { %v2035_v25 = vmul.f32 %v1587_v12, %v3543_v40  ;;  %v3911_v12 = vmul.f32 %v1708_v3, %v3541_v39 }
 0x423   :  { %v1589_v60 = vpop.f32.mrf.mxu1  ;;  %v1714_v31 = vpop.f32.mrf.mxu0 }
 0x424   :  { %v2038_v61 = vmul.f32 %v1714_v31, %v3549_v44 }
 0x425   :  { %v1593_v14 = vpop.f32.mrf.mxu1  ;;  %v1718_v32 = vpop.f32.mrf.mxu0 }
 0x427   :  { %v1595_v4 = vpop.f32.mrf.mxu1  ;;  %v1720_v57 = vpop.f32.mrf.mxu0 }
 0x428   :  { %v2044_v44 = vmul.f32 %v1595_v4, %v3555_v47  ;;  %v2046_v47 = vmul.f32 %v1720_v57, %v3557_v48  ;;  %v4244_v57 = vld [vmem:[#allocation39_spill] sm:$0xff] }
 0x429   :  { %v3851_v22 = vpop.f32.mrf.mxu1  ;;  %v3853_v17 = vpop.f32.mrf.mxu0 }
 0x42b   :  { %v1601_v7 = vpop.f32.mrf.mxu1  ;;  %v1726_v18 = vpop.f32.mrf.mxu0 }
 0x42d   :  { %v3855_v56 = vpop.f32.mrf.mxu1  ;;  %v3857_v21 = vpop.f32.mrf.mxu0 }
 0x42e   :  { %4228 = vst [vmem:[#allocation64_spill] sm:$0xff] %v3855_v56  ;;  %4229 = vst [vmem:[#allocation65_spill] sm:$0xff] %v3857_v21  ;;  %v2020_v56 = vmul.f32 %v1577_v55, %v3531_v34 }
 0x42f   :  { %v3859_v58 = vpop.f32.mrf.mxu1  ;;  %v3861_v1 = vpop.f32.mrf.mxu0 }
 0x430   :  { %4230 = vst [vmem:[#allocation66_spill] sm:$0xff] %v3859_v58  ;;  %4231 = vst [vmem:[#allocation67_spill] sm:$0xff] %v3861_v1  ;;  %v2022_v1 = vmul.f32 %v1702_v59, %v3533_v36 }
 0x431   :  { %v3863_v8 = vpop.f32.mrf.mxu1  ;;  %v3865_v9 = vpop.f32.mrf.mxu0 }
 0x433   :  { %v3867_v49 = vpop.f32.mrf.mxu1  ;;  %v3869_v24 = vpop.f32.mrf.mxu0 }
 0x435   :  { %v3871_v51 = vpop.f32.mrf.mxu1  ;;  %v3873_v26 = vpop.f32.mrf.mxu0 }
 0x436   :  { %4232 = vst [vmem:[#allocation68_spill] sm:$0xff] %v3871_v51  ;;  %4233 = vst [vmem:[#allocation69_spill] sm:$0xff] %v3873_v26  ;;  %v2036_v51 = vmul.f32 %v1589_v60, %v3547_v43 }
 0x437   :  { %v3875_v52 = vpop.f32.mrf.mxu1  ;;  %v3877_v28 = vpop.f32.mrf.mxu0 }
 0x438   :  { %4234 = vst [vmem:[#allocation70_spill] sm:$0xff] %v3875_v52  ;;  %4235 = vst [vmem:[#allocation71_spill] sm:$0xff] %v3877_v28  ;;  %v2019_v28 = vmul.f32 %v1575_v23, %v3527_v16  ;;  %v2021_v52 = vmul.f32 %v1700_v27, %v3529_v33  ;;  %v2066_v59 = vadd.f32 %v2036_v51, %v2035_v25 }
 0x439   :  { %v3879_v42 = vpop.f32.mrf.mxu1  ;;  %v3881_v37 = vpop.f32.mrf.mxu0  ;;  %v2043_v33 = vmul.f32 %v1593_v14, %v3551_v45  ;;  %v2045_v25 = vmul.f32 %v1718_v32, %v3553_v46  ;;  %v4242_v32 = vld [vmem:[#allocation17_spill] sm:$0xff] }
 0x43a   :  { %v2074_v34 = vadd.f32 %v2022_v1, %v2021_v52  ;;  %v4243_v1 = vld [vmem:[#allocation38_spill] sm:$0xff]  ;;  %v4246_v52 = vld [vmem:[#allocation33_spill] sm:$0xff] }
 0x43b   :  { %v1815_v62 = vpop.f32.mrf.mxu1  ;;  %v1940_v50 = vpop.f32.mrf.mxu0 }
 0x43d   :  { %v3883_v63 = vpop.f32.mrf.mxu1  ;;  %v3885_v2 = vpop.f32.mrf.mxu0 }
 0x43e   :  { %4236 = vst [vmem:[#allocation72_spill] sm:$0xff] %v3883_v63  ;;  %4237 = vst [vmem:[#allocation73_spill] sm:$0xff] %v3885_v2 }
 0x43f   :  { %v3887_v20 = vpop.f32.mrf.mxu1  ;;  %v3889_v21 = vpop.f32.mrf.mxu0 }
 0x440   :  { %4238 = vst [vmem:[#allocation74_spill] sm:$0xff] %v3887_v20  ;;  %4239 = vst [vmem:[#allocation75_spill] sm:$0xff] %v3889_v21  ;;  %v2037_v21 = vmul.f32 %v1712_v30, %v3545_v41  ;;  %v2064_v20 = vadd.f32 %v2020_v56, %v2019_v28  ;;  %v3908_v41 = vmul.f32 %v1583_v11, %v3539_v35  ;;  %v4240_v11 = vld [vmem:[#allocation44_spill] sm:$0xff] }
 0x441   :  { %v1825_v58 = vpop.f32.mrf.mxu1  ;;  %v1950_v26 = vpop.f32.mrf.mxu0  ;;  %v4241_v56 = vld [vmem:[#allocation16_spill] sm:$0xff] }
 0x442   :  { %v2076_v43 = vadd.f32 %v2038_v61, %v2037_v21  ;;  %v3904_v23 = vadd.f32 %v2074_v34, %v2064_v20  ;;  %v3914_v61 = vadd.f32 %v2044_v44, %v2043_v33  ;;  %v2052_v46 = vmul.f32 %v1601_v7, %v4241_v56  ;;  %v4247_v34 = vld [vmem:[#allocation14_spill] sm:$0xff] }
 0x443   :  { %v1827_v63 = vpop.f32.mrf.mxu1  ;;  %v1952_v2 = vpop.f32.mrf.mxu0  ;;  %v2054_v21 = vmul.f32 %v1726_v18, %v4242_v32  ;;  %v2023_v48 = vmul.f32 %v1825_v58, %v4243_v1  ;;  %v2077_v33 = vadd.f32 %v2046_v47, %v2045_v25 }
 0x444   :  { %v2106_v30 = vadd.f32 %v2076_v43, %v2066_v59  ;;  %v2024_v20 = vmul.f32 %v1827_v63, %v3611_v53  ;;  %v2026_v31 = vmul.f32 %v1952_v2, %v3613_v19  ;;  %v2025_v53 = vmul.f32 %v1950_v26, %v4244_v57  ;;  %v4245_v2 = vld [vmem:[#allocation32_spill] sm:$0xff]  ;;  %v4248_v59 = vld [vmem:[#allocation15_spill] sm:$0xff]  ;;  %v4249_v26 = vld [vmem:[#allocation30_spill] sm:$0xff] }
 0x445   :  { %v3899_v55 = vpop.f32.mrf.mxu1  ;;  %v3901_v36 = vpop.f32.mrf.mxu0  ;;  %v2008_v51 = vmul.f32 %v1815_v62, %v4245_v2  ;;  %v2053_v7 = vmul.f32 %v3853_v17, %v4248_v59 }
 0x446   :  { %v2084_v43 = vadd.f32 %v2024_v20, %v2023_v48  ;;  %v2094_v18 = vadd.f32 %v2026_v31, %v2025_v53  ;;  %v4256_v53 = vld [vmem:[#allocation48_spill] sm:$0xff] }
 0x447   :  { %v1833_v60 = vpop.f32.mrf.mxu1  ;;  %v1958_v16 = vpop.f32.mrf.mxu0 }
 0x448   :  { %v2114_v47 = vadd.f32 %v2094_v18, %v2084_v43  ;;  %v4262_v43 = vld [vmem:[#allocation41_spill] sm:$0xff] }
 0x449   :  { %v1837_v27 = vpop.f32.mrf.mxu1  ;;  %v1962_v40 = vpop.f32.mrf.mxu0 }
 0x44a   :  { %v2039_v4 = vmul.f32 %v1837_v27, %v3623_v5  ;;  %v2041_v35 = vmul.f32 %v1962_v40, %v3625_v10  ;;  %v2010_v5 = vmul.f32 %v1940_v50, %v4246_v52  ;;  %v2007_v27 = vmul.f32 %v3879_v42, %v4249_v26  ;;  %v4250_v40 = vld [vmem:[#allocation31_spill] sm:$0xff]  ;;  %v4259_v52 = vld [vmem:[#allocation42_spill] sm:$0xff]  ;;  %v4264_v26 = vld [vmem:[#allocation13_spill] sm:$0xff] }
 0x44b   :  { %v1839_v45 = vpop.f32.mrf.mxu1  ;;  %v1964_v14 = vpop.f32.mrf.mxu0  ;;  %v2009_v62 = vmul.f32 %v3881_v37, %v4250_v40  ;;  %v4265_v40 = vld [vmem:[#allocation36_spill] sm:$0xff] }
 0x44c   :  { %v2040_v39 = vmul.f32 %v1839_v45, %v3627_v13  ;;  %v2042_v3 = vmul.f32 %v1964_v14, %v4240_v11  ;;  %v2051_v13 = vmul.f32 %v3851_v22, %v4247_v34  ;;  %v2078_v14 = vadd.f32 %v2054_v21, %v2053_v7 }
 0x44d   :  { %v1843_v63 = vpop.f32.mrf.mxu1  ;;  %v1968_v19 = vpop.f32.mrf.mxu0  ;;  %v2092_v11 = vadd.f32 %v2010_v5, %v2009_v62  ;;  %v3960_v7 = vadd.f32 %v2114_v47, %v3904_v23  ;;  %v4266_v62 = vld [vmem:[#allocation74_spill] sm:$0xff]  ;;  %v4268_v23 = vld [vmem:[#allocation75_spill] sm:$0xff]  ;;  %v4273_v47 = vld [vmem:[#allocation73_spill] sm:$0xff] }
 0x44e   :  { %v2086_v28 = vadd.f32 %v2040_v39, %v2039_v4  ;;  %v2096_v10 = vadd.f32 %v2042_v3, %v2041_v35  ;;  %v2068_v45 = vadd.f32 %v2052_v46, %v2051_v13  ;;  %v4251_v4 = vld [vmem:[#allocation24_spill] sm:$0xff]  ;;  %v4252_v35 = vld [vmem:[#allocation25_spill] sm:$0xff]  ;;  %v2082_v39 = vadd.f32 %v2008_v51, %v2007_v27  ;;  %v4258_v51 = vld [vmem:[#allocation23_spill] sm:$0xff] }
 0x44f   :  { %v1845_v44 = vpop.f32.mrf.mxu1  ;;  %v1970_v58 = vpop.f32.mrf.mxu0  ;;  %v1992_v22 = vmul.f32 %v3867_v49, %v4251_v4  ;;  %v1994_v17 = vmul.f32 %v3869_v24, %v4252_v35  ;;  %v4253_v3 = vld [vmem:[#allocation45_spill] sm:$0xff]  ;;  %v2049_v56 = vmul.f32 %v1968_v19, %v3633_v6  ;;  %v4254_v49 = vld [vmem:[#allocation46_spill] sm:$0xff]  ;;  %v4255_v24 = vld [vmem:[#allocation47_spill] sm:$0xff]  ;;  %v2032_v6 = vmul.f32 %v1833_v60, %v4259_v52 }
 0x450   :  { %v2116_v50 = vadd.f32 %v2096_v10, %v2086_v28  ;;  %v2048_v25 = vmul.f32 %v1845_v44, %v3635_v38  ;;  %v2050_v42 = vmul.f32 %v1970_v58, %v3637_v0  ;;  %v2047_v37 = vmul.f32 %v1843_v63, %v4253_v3  ;;  %v4257_v38 = vld [vmem:[#allocation22_spill] sm:$0xff]  ;;  %v4260_v19 = vld [vmem:[#allocation43_spill] sm:$0xff]  ;;  %v4263_v44 = vld [vmem:[#allocation12_spill] sm:$0xff] }
 0x451   :  { %v1849_v20 = vpop.f32.mrf.mxu1  ;;  %v1974_v31 = vpop.f32.mrf.mxu0  ;;  %v1991_v0 = vmul.f32 %v3863_v8, %v4257_v38  ;;  %v1993_v63 = vmul.f32 %v3865_v9, %v4258_v51  ;;  %v2034_v5 = vmul.f32 %v1958_v16, %v4260_v19  ;;  %v2112_v59 = vadd.f32 %v2092_v11, %v2082_v39  ;;  %v4261_v8 = vld [vmem:[#allocation40_spill] sm:$0xff]  ;;  %v4267_v4 = vld [vmem:[#allocation37_spill] sm:$0xff]  ;;  %v4270_v39 = vld [vmem:[#allocation34_spill] sm:$0xff] }
 0x452   :  { %v3945_v21 = vadd.f32 %v2116_v50, %v2106_v30  ;;  %v2055_v1 = vmul.f32 %v1849_v20, %v4254_v49  ;;  %v2057_v48 = vmul.f32 %v1974_v31, %v4255_v24  ;;  %v2087_v30 = vadd.f32 %v2048_v25, %v2047_v37  ;;  %v4271_v11 = vld [vmem:[#allocation72_spill] sm:$0xff]  ;;  %v4282_v51 = vld [vmem:[#allocation69_spill] sm:$0xff] }
 0x453   :  { %v1851_v46 = vpop.f32.mrf.mxu1  ;;  %v1976_v32 = vpop.f32.mrf.mxu0  ;;  %v2097_v28 = vadd.f32 %v2050_v42, %v2049_v56  ;;  %v2090_v13 = vadd.f32 %v1994_v17, %v1993_v63  ;;  %v2031_v9 = vmul.f32 %v3899_v55, %v4261_v8  ;;  %v2033_v60 = vmul.f32 %v3901_v36, %v4262_v43  ;;  %v4269_v17 = vld [vmem:[#allocation62_spill] sm:$0xff]  ;;  %v4272_v42 = vld [vmem:[#allocation35_spill] sm:$0xff]  ;;  %v4274_v37 = vld [vmem:[#allocation28_spill] sm:$0xff] }
 0x454   :  { %v2056_v57 = vmul.f32 %v1851_v46, %v3643_v15  ;;  %v2058_v2 = vmul.f32 %v1976_v32, %v4256_v53  ;;  %2153 = vrot.lane.b32.xlu0 %v3945_v21, %s2945_s13  ;;  %v2080_v15 = vadd.f32 %v1992_v22, %v1991_v0  ;;  %v2108_v16 = vadd.f32 %v2078_v14, %v2068_v45  ;;  %v4275_v56 = vld [vmem:[#allocation70_spill] sm:$0xff]  ;;  %v4276_v46 = vld [vmem:[#allocation29_spill] sm:$0xff]  ;;  %v4277_v32 = vld [vmem:[#allocation71_spill] sm:$0xff] }
 0x455   :  { %v2027_v58 = vmul.f32 %v3847_v54, %v4263_v44  ;;  %v2029_v27 = vmul.f32 %v3849_v29, %v4264_v26  ;;  %v2016_v50 = vmul.f32 %v4266_v62, %v4265_v40  ;;  %v2018_v22 = vmul.f32 %v4268_v23, %v4267_v4  ;;  %v4278_v24 = vld [vmem:[#allocation60_spill] sm:$0xff]  ;;  %v4279_v53 = vld [vmem:[#allocation26_spill] sm:$0xff]  ;;  %v4281_v0 = vld [vmem:[#allocation27_spill] sm:$0xff] }
 0x456   :  { %v2088_v10 = vadd.f32 %v2056_v57, %v2055_v1  ;;  %v2098_v34 = vadd.f32 %v2058_v2, %v2057_v48  ;;  %v2085_v55 = vadd.f32 %v2032_v6, %v2031_v9  ;;  %v2095_v35 = vadd.f32 %v2034_v5, %v2033_v60  ;;  %v4280_v2 = vld [vmem:[#allocation68_spill] sm:$0xff]  ;;  %v4284_v6 = vld [vmem:[#allocation66_spill] sm:$0xff]  ;;  %v4285_v5 = vld [vmem:[#allocation21_spill] sm:$0xff] }
 0x457   :  { %v2117_v36 = vadd.f32 %v2097_v28, %v2087_v30  ;;  %v2065_v14 = vadd.f32 %v3908_v41, %v2027_v58  ;;  %v2110_v54 = vadd.f32 %v2090_v13, %v2080_v15  ;;  %v3980_v20 = vadd.f32 %v2112_v59, %v4269_v17  ;;  %v4283_v52 = vld [vmem:[#allocation20_spill] sm:$0xff]  ;;  %v4286_v30 = vld [vmem:[#allocation67_spill] sm:$0xff]  ;;  %v4287_v59 = vld [vmem:[#allocation18_spill] sm:$0xff] }
 0x458   :  { %v2118_v18 = vadd.f32 %v2098_v34, %v2088_v10  ;;  %2149 = vrot.lane.b32.xlu0 %v3960_v7, %s2945_s13  ;;  %v2075_v29 = vadd.f32 %v3911_v12, %v2029_v27  ;;  %v2107_v31 = vadd.f32 %v2077_v33, %v3914_v61  ;;  %v2015_v25 = vmul.f32 %v4271_v11, %v4270_v39  ;;  %v4288_v8 = vld [vmem:[#allocation64_spill] sm:$0xff]  ;;  %v4289_v43 = vld [vmem:[#allocation19_spill] sm:$0xff]  ;;  %v4290_v60 = vld [vmem:[#allocation65_spill] sm:$0xff] }
 0x459   :  { %v2017_v3 = vmul.f32 %v4273_v47, %v4272_v42  ;;  %v2000_v41 = vmul.f32 %v4275_v56, %v4274_v37  ;;  %v2002_v49 = vmul.f32 %v4277_v32, %v4276_v46  ;;  %v2115_v33 = vadd.f32 %v2095_v35, %v2085_v55  ;;  %v4291_v26 = vld [vmem:[#allocation63_spill] sm:$0xff]  ;;  %v4292_v62 = vld [vmem:[#allocation61_spill] sm:$0xff]  ;;  %v4294_v11 = vld [vmem:[#allocation6_spill] sm:$0xff] }
 0x45a   :  { %v3976_v45 = vadd.f32 %v2118_v18, %v2108_v16  ;;  %v2083_v12 = vadd.f32 %v2016_v50, %v2015_v25  ;;  %v2127_v1 = vadd.f32 %v2117_v36, %v2107_v31  ;;  %v3997_v48 = vadd.f32 %v2110_v54, %v4278_v24  ;;  %v4293_v4 = vld [vmem:[#allocation59_spill] sm:$0xff]  ;;  %v2269_v55 = vld [vmem:[%s4113_s0 + $0x40] sm:$0xff]  ;;  %v2262_v31 = vld [vmem:[%s4113_s0 + $0x8] sm:$0xff] }
 0x45b   :  { %v2093_v61 = vadd.f32 %v2018_v22, %v2017_v3  ;;  %v2105_v57 = vadd.f32 %v2075_v29, %v2065_v14  ;;  %v1999_v38 = vmul.f32 %v4280_v2, %v4279_v53  ;;  %v2001_v63 = vmul.f32 %v4282_v51, %v4281_v0  ;;  %v2270_v22 = vld [vmem:[%s4113_s0 + $0x48] sm:$0xff]  ;;  %v2268_v35 = vld [vmem:[%s4113_s0 + $0x38] sm:$0xff]  ;;  %v2267_v36 = vld [vmem:[%s4113_s0 + $0x30] sm:$0xff] }
 0x45c   :  { %2157 = vrot.lane.b32.xlu1 %v3976_v45, %s2945_s13  ;;  %2145 = vrot.lane.b32.xlu0 %v3980_v20, %s2945_s13  ;;  %v1984_v19 = vmul.f32 %v4284_v6, %v4283_v52  ;;  %v1986_v28 = vmul.f32 %v4286_v30, %v4285_v5  ;;  %v1983_v9 = vmul.f32 %v4288_v8, %v4287_v59  ;;  %v2266_v14 = vld [vmem:[%s4113_s0 + $0x28] sm:$0xff]  ;;  %v2265_v54 = vld [vmem:[%s4113_s0 + $0x20] sm:$0xff] }
 0x45d   :  { %v2081_v10 = vadd.f32 %v2000_v41, %v1999_v38  ;;  %v2091_v34 = vadd.f32 %v2002_v49, %v2001_v63  ;;  %v2113_v15 = vadd.f32 %v2093_v61, %v2083_v12  ;;  %v2125_v13 = vadd.f32 %v2115_v33, %v2105_v57  ;;  %v2264_v17 = vld [vmem:[%s4113_s0 + $0x18] sm:$0xff]  ;;  %v2263_v29 = vld [vmem:[%s4113_s0 + $0x10] sm:$0xff]  ;;  %v2261_v39 = vld [vmem:[%s4113_s0] sm:$0xff] }
 0x45e   :  { %v1985_v16 = vmul.f32 %v4290_v60, %v4289_v43  ;;  %v2079_v18 = vadd.f32 %v1984_v19, %v1983_v9  ;;  %v4295_v57 = vld [vmem:[#allocation10_spill] sm:$0xff]  ;;  %v4296_v38 = vld [vmem:[#allocation9_spill] sm:$0xff] }
 0x45f   :  { %v2111_v58 = vadd.f32 %v2091_v34, %v2081_v10  ;;  %v2123_v27 = vadd.f32 %v2113_v15, %v4291_v26  ;;  %v2249_v53 = vmul.u32 5, %v4295_v57  ;;  %v4299_v43 = vld [vmem:[#allocation57_spill] sm:$0xff] }
 0x460   :  { %2155 = vrot.lane.b32.xlu1 %v2127_v1, %s2945_s13  ;;  %2141 = vrot.lane.b32.xlu0 %v3997_v48, %s2945_s13  ;;  %v2089_v44 = vadd.f32 %v1986_v28, %v1985_v16 }
 0x461   :  { %v2121_v50 = vadd.f32 %v2111_v58, %v4292_v62  ;;  %v2253_v2 = vadd.s32 5, %v2249_v53  ;;  %vm2251_vm14 = vcmp.ge.s32.totalorder %v4296_v38, %v2249_v53  ;;  %v4300_v58 = vld [vmem:[#allocation56_spill] sm:$0xff] }
 0x462   :  { %v2109_v40 = vadd.f32 %v2089_v44, %v2079_v18 }
 0x463   :  { %vm2255_vm9 = vcmp.lt.s32.totalorder %v4296_v38, %v2253_v2 }
 0x464   :  { %2151 = vrot.lane.b32.xlu1 %v2125_v13, %s2945_s13  ;;  %v2119_v23 = vadd.f32 %v2109_v40, %v4293_v4  ;;  %vm2257_vm13 = vmand %vm2251_vm14, %vm2255_vm9 }
 0x468   :  { %2147 = vrot.lane.b32.xlu1 %v2123_v27, %s2945_s13 }
 0x46c   :  { %2143 = vrot.lane.b32.xlu1 %v2121_v50, %s2945_s13 }
 0x470   :  { %2139 = vrot.lane.b32.xlu1 %v2119_v23, %s2945_s13 }
 0x474   :  { %2318 = vperm.xlu1 %2836, %v2270_v22  }
 0x478   :  { %2313 = vperm.xlu1 %2836, %v2269_v55  }
 0x47c   :  { %2308 = vperm.xlu1 %2836, %v2268_v35   ;;  %v4303_v35 = vld [vmem:[#allocation54_spill] sm:$0xff] }
 0x480   :  { %2303 = vperm.xlu1 %2836, %v2267_v36  }
 0x484   :  { %2298 = vperm.xlu1 %2836, %v2266_v14  }
 0x488   :  { %2293 = vperm.xlu1 %2836, %v2265_v54  }
 0x48c   :  { %2288 = vperm.xlu1 %2836, %v2264_v17  }
 0x490   :  { %2283 = vperm.xlu1 %2836, %v2263_v29  }
 0x494   :  { %2278 = vperm.xlu1 %2836, %v2262_v31  }
 0x498   :  { %2273 = vperm.xlu1 %2836, %v2261_v39   ;;  %v4304_v39 = vld [vmem:[#allocation53_spill] sm:$0xff] }
 0x49c   :  { %2335 = vrot.lane.b32.xlu1 %v4294_v11, %s2947_s5 }
 0x4c6   :  { %v2154_v25 = vpop.permute.xlu0 %2153 }
 0x4c7   :  { %v2176_v46 = vadd.f32 %v2154_v25, %v3945_v21 }
 0x4ca   :  { %v2150_v42 = vpop.permute.xlu0 %2149 }
 0x4cb   :  { %v2174_v47 = vadd.f32 %v2150_v42, %v3960_v7 }
 0x4cd   :  { %2199 = vrot.lane.b32.xlu0 %v2174_v47, %s2947_s5 }
 0x4ce   :  { %v2158_v3 = vpop.permute.xlu1 %2157  ;;  %v2146_v61 = vpop.permute.xlu0 %2145 }
 0x4cf   :  { %v2178_v49 = vadd.f32 %v2158_v3, %v3976_v45  ;;  %v2172_v33 = vadd.f32 %v2146_v61, %v3980_v20  ;;  %v4297_v20 = vmov 0.0   ;;  %v4305_v3 = vld [vmem:[#allocation52_spill] sm:$0xff] }
 0x4d0   :  { %v2259_v51 = vsel %vm2257_vm13, 1.0, %v4297_v20 }
 0x4d1   :  { %2824 = vmatprep.mubr.msk.f32.mxu1 %vm2339_vm7, %v2259_v51 }
 0x4d2   :  { %v2156_v37 = vpop.permute.xlu1 %2155 }
 0x4d3   :  { %v2177_v32 = vadd.f32 %v2156_v37, %v2127_v1  ;;  %v2142_v1 = vpop.permute.xlu0 %2141 }
 0x4d4   :  { %v4067_v45 = vadd.f32 %v2142_v1, %v3997_v48  ;;  %v4298_v48 = vld [vmem:[#allocation5_spill] sm:$0xff] }
 0x4d6   :  { %v2152_v56 = vpop.permute.xlu1 %2151 }
 0x4d7   :  { %v2175_v41 = vadd.f32 %v2152_v56, %v2125_v13 }
 0x4d9   :  { %2201 = vrot.lane.b32.xlu0 %v2175_v41, %s2947_s5 }
 0x4da   :  { %v2148_v12 = vpop.permute.xlu1 %2147 }
 0x4db   :  { %v2173_v7 = vadd.f32 %v2148_v12, %v2123_v27  ;;  %v4301_v27 = vld [vmem:[#allocation58_spill] sm:$0xff] }
 0x4dd   :  { %2203 = vrot.lane.b32.xlu0 %v2176_v46, %s2947_s5 }
 0x4de   :  { %v2144_v24 = vpop.permute.xlu1 %2143 }
 0x4df   :  { %v2171_v21 = vadd.f32 %v2144_v24, %v2121_v50  ;;  %v4302_v50 = vld [vmem:[#allocation55_spill] sm:$0xff] }
 0x4e1   :  { %2205 = vrot.lane.b32.xlu0 %v2177_v32, %s2947_s5 }
 0x4e2   :  { %v2140_v0 = vpop.permute.xlu1 %2139 }
 0x4e3   :  { %v4075_v63 = vadd.f32 %v2140_v0, %v2119_v23 }
 0x4e5   :  { %2207 = vrot.lane.b32.xlu0 %v2178_v49, %s2947_s5 }
 0x4e9   :  { %2197 = vrot.lane.b32.xlu0 %v2173_v7, %s2947_s5 }
 0x4ed   :  { %2195 = vrot.lane.b32.xlu0 %v2172_v33, %s2947_s5 }
 0x4ef   :  { %v2319_v52 = vpop.permute.xlu1 %2318 }
 0x4f1   :  { %2193 = vrot.lane.b32.xlu0 %v2171_v21, %s2947_s5 }
 0x4f3   :  { %v2314_v6 = vpop.permute.xlu1 %2313 }
 0x4f5   :  { %2191 = vrot.lane.b32.xlu0 %v4067_v45, %s2947_s5 }
 0x4f7   :  { %v2309_v19 = vpop.permute.xlu1 %2308 }
 0x4f9   :  { %2189 = vrot.lane.b32.xlu0 %v4075_v63, %s2947_s5 }
 0x4fb   :  { %v2304_v28 = vpop.permute.xlu1 %2303 }
 0x4fd   :  { %2333 = vrot.lane.b32.xlu0 %v4298_v48, %s2947_s5  ;;  %v4308_v48 = vld [vmem:[#allocation50_spill] sm:$0xff] }
 0x4ff   :  { %v2299_v34 = vpop.permute.xlu1 %2298 }
 0x503   :  { %v2294_v18 = vpop.permute.xlu1 %2293 }
 0x507   :  { %v2289_v17 = vpop.permute.xlu1 %2288 }
 0x50b   :  { %v2284_v12 = vpop.permute.xlu1 %2283 }
 0x53f   :  { %v2200_v5 = vpop.permute.xlu0 %2199 }
 0x540   :  { %v2224_v44 = vadd.f32 %v2200_v5, %v2174_v47 }
 0x542   :  { %v2234_v36 = vadd.f32 %v2224_v44, %v4303_v35 }
 0x544   :  { %v2244_v47 = vand.u32 2147483647, %v2234_v36 }
 0x546   :  { %v2326_v53 = vmul.f32 %v2299_v34, %v2244_v47 }
 0x54b   :  { %v2202_v30 = vpop.permute.xlu0 %2201 }
 0x54c   :  { %v2225_v9 = vadd.f32 %v2202_v30, %v2175_v41 }
 0x54e   :  { %v2235_v4 = vadd.f32 %v2225_v9, %v4302_v50 }
 0x54f   :  { %v2204_v10 = vpop.permute.xlu0 %2203 }
 0x550   :  { %v2226_v59 = vadd.f32 %v2204_v10, %v2176_v46  ;;  %v2245_v31 = vand.u32 2147483647, %v2235_v4  ;;  %v4311_v4 = vld [vmem:[#allocation8_spill] sm:$0xff] }
 0x552   :  { %v2236_v26 = vadd.f32 %v2226_v59, %v4300_v58 }
 0x553   :  { %v2206_v15 = vpop.permute.xlu0 %2205 }
 0x554   :  { %v2227_v13 = vadd.f32 %v2206_v15, %v2177_v32  ;;  %v2246_v14 = vand.u32 2147483647, %v2236_v26 }
 0x556   :  { %v2237_v60 = vadd.f32 %v2227_v13, %v4299_v43  ;;  %v2328_v56 = vmul.f32 %v2309_v19, %v2246_v14  ;;  %v2279_v19 = vpop.permute.xlu1 %2278 }
 0x557   :  { %v2208_v8 = vpop.permute.xlu0 %2207 }
 0x558   :  { %v2228_v16 = vadd.f32 %v2208_v8, %v2178_v49  ;;  %v2247_v23 = vand.u32 2147483647, %v2237_v60  ;;  %v2327_v49 = vmul.f32 %v2304_v28, %v2245_v31 }
 0x55a   :  { %v2238_v40 = vadd.f32 %v2228_v16, %v4301_v27  ;;  %v2329_v42 = vmul.f32 %v2314_v6, %v2247_v23  ;;  %v2274_v59 = vpop.permute.xlu1 %2273 }
 0x55b   :  { %v2198_v62 = vpop.permute.xlu0 %2197 }
 0x55c   :  { %v2248_v22 = vand.u32 2147483647, %v2238_v40  ;;  %v2223_v55 = vadd.f32 %v2198_v62, %v2173_v7  ;;  %v4306_v7 = vld [vmem:[#allocation11_spill] sm:$0xff] }
 0x55d   :  { %v2250_v61 = vmul.u32 5, %v4306_v7  ;;  %v4310_v40 = vld [vmem:[#allocation7_spill] sm:$0xff] }
 0x55e   :  { %v2330_v54 = vmul.f32 %v2319_v52, %v2248_v22  ;;  %v2233_v11 = vadd.f32 %v2223_v55, %v4304_v39  ;;  %v2336_v9 = vpop.permute.xlu1 %2335 }
 0x55f   :  { %v2196_v29 = vpop.permute.xlu0 %2195  ;;  %vm2252_vm8 = vcmp.ge.s32.totalorder %v4296_v38, %v2250_v61 }
 0x560   :  { %v2222_v25 = vadd.f32 %v2196_v29, %v2172_v33  ;;  %2804 = vmatprep.subr.mxu1 %v2330_v54  ;;  %v2243_v46 = vand.u32 2147483647, %v2233_v11  ;;  %v4307_v33 = vld [vmem:[#allocation51_spill] sm:$0xff] }
 0x561   :  { %2805 = vmatpush3.msra.mxu1 %v2330_v54 }
 0x562   :  { %v2232_v37 = vadd.f32 %v2222_v25, %v4305_v3  ;;  %2806 = vmatprep.subr.mxu1 %v2329_v42  ;;  %v2325_v51 = vmul.f32 %v2294_v18, %v2243_v46 }
 0x563   :  { %v2194_v41 = vpop.permute.xlu0 %2193  ;;  %2807 = vmatpush3.msra.mxu1 %v2329_v42 }
 0x564   :  { %v2221_v32 = vadd.f32 %v2194_v41, %v2171_v21  ;;  %2808 = vmatprep.subr.mxu1 %v2328_v56  ;;  %v2242_v24 = vand.u32 2147483647, %v2232_v37  ;;  %v2254_v21 = vadd.s32 5, %v2250_v61 }
 0x565   :  { %2809 = vmatpush3.msra.mxu1 %v2328_v56 }
 0x566   :  { %v2231_v57 = vadd.f32 %v2221_v32, %v4307_v33  ;;  %2810 = vmatprep.subr.mxu1 %v2327_v49  ;;  %v2324_v6 = vmul.f32 %v2289_v17, %v2242_v24  ;;  %vm2256_vm11 = vcmp.lt.s32.totalorder %v4296_v38, %v2254_v21 }
 0x567   :  { %v2192_v1 = vpop.permute.xlu0 %2191  ;;  %2811 = vmatpush3.msra.mxu1 %v2327_v49  ;;  %vm2258_vm0 = vmand %vm2252_vm8, %vm2256_vm11 }
 0x568   :  { %v2241_v2 = vand.u32 2147483647, %v2231_v57  ;;  %v2220_v0 = vadd.f32 %v2192_v1, %v4067_v45  ;;  %2812 = vmatprep.subr.mxu1 %v2326_v53  ;;  %v4309_v45 = vld [vmem:[#allocation49_spill] sm:$0xff] }
 0x569   :  { %2813 = vmatpush3.msra.mxu1 %v2326_v53 }
 0x56a   :  { %v2230_v52 = vadd.f32 %v2220_v0, %v4308_v48  ;;  %2814 = vmatprep.subr.mxu1 %v2325_v51  ;;  %v2323_v10 = vmul.f32 %v2284_v12, %v2241_v2 }
 0x56b   :  { %v2190_v5 = vpop.permute.xlu0 %2189  ;;  %2815 = vmatpush3.msra.mxu1 %v2325_v51 }
 0x56c   :  { %v2240_v30 = vand.u32 2147483647, %v2230_v52  ;;  %v2219_v28 = vadd.f32 %v2190_v5, %v4075_v63  ;;  %2816 = vmatprep.subr.mxu1 %v2324_v6  ;;  %v2260_v63 = vsel %vm2258_vm0, 1.0, %v4297_v20  ;;  %v2468_v20 = vld [vmem:[%s4117_s4 + $0x40] ss:$0 sm:$0xff] }
 0x56d   :  { %2817 = vmatpush3.msra.mxu1 %v2324_v6  ;;  %v247_v62 = vadd.f32 %v4310_v40, %v2468_v20  ;;  %v242_v23 = vadd.f32 %v2468_v20, %v4311_v4 }
 0x56e   :  { %v2229_v34 = vadd.f32 %v2219_v28, %v4309_v45  ;;  %2818 = vmatprep.subr.mxu1 %v2323_v10  ;;  %v2322_v15 = vmul.f32 %v2279_v19, %v2240_v30 }
 0x56f   :  { %2819 = vmatpush3.msra.mxu1 %v2323_v10  ;;  %v2334_v60 = vpop.permute.xlu0 %2333  ;;  %v251_v35 = vand.u32 2147483647, %v247_v62  ;;  %v250_v54 = vand.u32 2147483647, %v242_v23 }
 0x570   :  { %v2239_v13 = vand.u32 2147483647, %v2229_v34  ;;  %2820 = vmatprep.subr.mxu1 %v2322_v15 }
 0x571   :  { %2821 = vmatpush3.msra.mxu1 %v2322_v15 }
 0x572   :  { %v2321_v8 = vmul.f32 %v2274_v59, %v2239_v13 }
 0x574   :  { %2822 = vmatprep.subr.mxu1 %v2321_v8 }
 0x575   :  { %2823 = vmatpush3.msra.mxu1 %v2321_v8 }
 0x576   :  { %2825 = vmatmul.mubr.msk.f32.vlgmr.msra.gmra.mxu1 %vm2339_vm7, %v2260_v63 }
 0x636   :  { %v2826_v43 = vpop.f32.mrf.mxu1 }
 0x637   :  { %v2418_v38 = vadd.f32 %v2826_v43, %v2336_v9 }
 0x638   :  { %v2412_v16 = vpop.f32.mrf.mxu1 }
 0x639   :  { %v2424_v18 = vmin.f32 %v2418_v38, 0.0  ;;  %v2413_v44 = vadd.f32 %v2412_v16, %v2334_v60  ;;  %vm2422_vm6 = vcmp.gt.f32.partialorder %v2418_v38, 0.0 }
 0x63b   :  { %v2427_v58 = vmul.f32 1.442695, %v2424_v18  ;;  %v2423_v26 = vmin.f32 %v2413_v44, 0.0  ;;  %vm2421_vm10 = vcmp.gt.f32.partialorder %v2413_v44, 0.0 }
 0x63d   :  { %2913 = vpow2.f32 %v2427_v58  ;;  %v2425_v27 = vmul.f32 1.442695, %v2423_v26 }
 0x63f   :  { %2915 = vpow2.f32 %v2425_v27 }
 0x64a   :  { %v2914_v50 = vpop.eup %2913 }
 0x64b   :  { %v2637_v22 = vadd.f32 -1.0, %v2914_v50 }
 0x64c   :  { %v2916_v55 = vpop.eup %2915 }
 0x64d   :  { %v2432_v36 = vsel %vm2422_vm6, %v2418_v38, %v2637_v22  ;;  %v2636_v14 = vadd.f32 -1.0, %v2916_v55 }
 0x64e   :  { %v2434_v17 = vmul.f32 %v2432_v36, %v251_v35 }
 0x64f   :  { %v2431_v29 = vsel %vm2421_vm10, %v2413_v44, %v2636_v14 }
 0x650   :  { %v2438_v31 = vsel %vm1448_vm5, %v2434_v17, 0.0  ;;  %v2433_v39 = vmul.f32 %v2431_v29, %v250_v54 }
 0x651   :  { %2439 = vadd.xlane.f32.xlu1 %v2438_v31 }
 0x652   :  { %v2435_v11 = vsel %vm1448_vm5, %v2433_v39, 0.0 }
 0x653   :  { %2436 = vadd.xlane.f32.xlu0 %v2435_v11 }
 0x6da   :  { %v2440_v25 = vpop.xlane.xlu1 %2439 }
 0x6db   :  { %v2442_v42 = vadd.f32 %v2440_v25, %v247_v62 }
 0x6dc   :  { %v2437_v47 = vpop.xlane.xlu0 %2436 }
 0x6dd   :  { %v2441_v3 = vadd.f32 %v2437_v47, %v242_v23  ;;  %2447 = vrot.lane.b32.xlu1 %v2442_v42, %s2947_s5 }
 0x6df   :  { %2445 = vrot.lane.b32.xlu0 %v2441_v3, %s2947_s5 }
 0x74f   :  { %v2448_v37 = vpop.permute.xlu1 %2447 }
 0x750   :  { %2453 = vst.msk [vmem:[%s4120_s7 + $0x8] sm:$0xff] %vm2451_vm15, %v2448_v37 }
 0x751   :  { %v2446_v56 = vpop.permute.xlu0 %2445 }
 0x752   :  { %2452 = vst.msk [vmem:[%s4120_s7] sm:$0xff] %vm2451_vm15, %v2446_v56 }
 0x753   :  { %2458 = vsyncpa [#allocation3], 1 }

</bundles_post_ra>
